<compile_context>
chip_gen: v7x
topology: tpu7x:2x2x1
jax: 0.10.0
libtpu: 0.0.40
codegen_flags: <defaults>
</compile_context>

<pallas_src>
import functools

import jax
import jax.numpy as jnp
from jax.experimental import pallas as pl
from jax.experimental.pallas import tpu as pltpu


PACK = 128  # lane-dense packed output width (pooled lanes [0,H) + logit lane H)


# ----------------------------------------------------------------------------
# Single fused kernel (per batch row): embeddings-LN -> L encoder layers
#                                      -> mean-pool -> packed (pooled | logit)
# ----------------------------------------------------------------------------

def _bert_fused_kernel(emb_ref, bias_ref,
                       emb_ln_g_ref, emb_ln_b_ref,
                       wqkv_ref, bqkv_ref, wo_ref, bo_ref,
                       ln1_g_ref, ln1_b_ref,
                       wi_ref, bi_ref, wo2_ref, bo2_ref,
                       ln2_g_ref, ln2_b_ref,
                       pack_w_ref, pack_b_ref,
                       packed_ref,
                       *, S, S_sub, H, nh, L, eps=1e-12):
    dh = H // nh
    scale = 1.0 / float(dh) ** 0.5

    def layernorm(x, g, b):
        mu = jnp.mean(x, axis=-1, keepdims=True)
        var = jnp.mean((x - mu) ** 2, axis=-1, keepdims=True)
        return (x - mu) * jax.lax.rsqrt(var + eps) * g + b

    # ---- embedding LayerNorm (f32) ----
    x = layernorm(emb_ref[...].astype(jnp.float32),
                  emb_ln_g_ref[...], emb_ln_b_ref[...])            # (S, H)

    # additive key-mask bias, hoisted once, broadcast over heads & queries
    bias = bias_ref[...][None, :, :]                               # (1, 1, S)

    for l in range(L):
        # ---- fused QKV projection: one (S, H) x (H, 3H) bf16 matmul ----
        qkv = jnp.dot(x.astype(jnp.bfloat16), wqkv_ref[l],
                      preferred_element_type=jnp.float32) + bqkv_ref[l]   # (S, 3H)
        q = qkv[:, 0 * H:1 * H]
        k = qkv[:, 1 * H:2 * H]
        v = qkv[:, 2 * H:3 * H]

        # ---- one head split per layer: (S, H) -> (nh, S, dh) ----
        qh = jnp.swapaxes(q.reshape(S, nh, dh), 0, 1)
        kh = jnp.swapaxes(k.reshape(S, nh, dh), 0, 1)
        vh = jnp.swapaxes(v.reshape(S, nh, dh), 0, 1)

        # ---- batched attention over all heads at once ----
        s = jnp.einsum('hqd,hkd->hqk',
                       qh.astype(jnp.bfloat16), kh.astype(jnp.bfloat16),
                       preferred_element_type=jnp.float32) * scale + bias  # (nh, S, S)
        m = jnp.max(s, axis=-1, keepdims=True)                      # one batched XLU reduce
        p = jnp.exp(s - m)
        # TODO(synk): approx reciprocal (EUP vrcp) instead of exact divide; tiny rel. error.
        p = p * pl.reciprocal(jnp.sum(p, axis=-1, keepdims=True), approx=True)
        ctxh = jnp.einsum('hqk,hkd->hqd',
                          p.astype(jnp.bfloat16), vh.astype(jnp.bfloat16),
                          preferred_element_type=jnp.float32)        # (nh, S, dh)

        # ---- one head merge per layer: (nh, S, dh) -> (S, H) ----
        ctx = jnp.swapaxes(ctxh, 0, 1).reshape(S, H)

        # ---- attention output projection + add & LayerNorm ----
        attn_out = jnp.dot(ctx.astype(jnp.bfloat16), wo_ref[l],
                           preferred_element_type=jnp.float32) + bo_ref[l]
        x = layernorm(attn_out + x, ln1_g_ref[l], ln1_b_ref[l])

        # ---- feed-forward + add & LayerNorm ----
        inter = jnp.dot(x.astype(jnp.bfloat16), wi_ref[l],
                        preferred_element_type=jnp.float32) + bi_ref[l]
        # TODO(synk): HF BERT uses exact erf-GELU; tanh-approx GELU used (safe lowering).
        inter = jax.nn.gelu(inter)
        ffn_out = jnp.dot(inter.astype(jnp.bfloat16), wo2_ref[l],
                          preferred_element_type=jnp.float32) + bo2_ref[l]
        x = layernorm(ffn_out + x, ln2_g_ref[l], ln2_b_ref[l])

    # ---- y[:, :subset] (subset > S -> no-op) -> mean over seq ----
    pooled = jnp.mean(x[:S_sub, :], axis=0, keepdims=True)          # (1, H), f32

    # ---- lane-dense packed output: [pooled | logit | 0...] via one (H,128) matmul ----
    packed = jnp.dot(pooled, pack_w_ref[...],
                     preferred_element_type=jnp.float32) + pack_b_ref[...]  # (1, 128)
    packed_ref[...] = packed.astype(packed_ref.dtype)


# ----------------------------------------------------------------------------
# Parameter construction (deterministic, synthetic "pretrained" weights)
# ----------------------------------------------------------------------------

CFG = dict(vocab=100, max_pos=16, type_vocab=2,
           hidden=32, heads=4, ff=64, layers=2,
           output_size=1, subset=50)


def init_params(key, cfg):
    H, F_, L = cfg["hidden"], cfg["ff"], cfg["layers"]

    def nrm(k, shape, scale=0.02):
        return (scale * jax.random.normal(k, shape)).astype(jnp.float32)

    keys = iter(jax.random.split(key, 64))
    p = {
        "word_emb": nrm(next(keys), (cfg["vocab"], H)),
        "pos_emb": nrm(next(keys), (cfg["max_pos"], H)),
        "type_emb": nrm(next(keys), (cfg["type_vocab"], H)),
        "emb_ln_g": jnp.ones((1, H), jnp.float32),
        "emb_ln_b": jnp.zeros((1, H), jnp.float32),
        "fc_w": nrm(next(keys), (H, cfg["output_size"])),
        "fc_b": jnp.zeros((1, cfg["output_size"]), jnp.float32),
    }
    wqkv, bqkv, wo, bo = [], [], [], []
    ln1g, ln1b, wi, bi, wo2, bo2, ln2g, ln2b = [], [], [], [], [], [], [], []
    for _ in range(L):
        wq = nrm(next(keys), (H, H))
        wk = nrm(next(keys), (H, H))
        wv = nrm(next(keys), (H, H))
        wqkv.append(jnp.concatenate([wq, wk, wv], axis=1))          # fused (H, 3H)
        bqkv.append(jnp.zeros((1, 3 * H), jnp.float32))
        wo.append(nrm(next(keys), (H, H)));  bo.append(jnp.zeros((1, H), jnp.float32))
        ln1g.append(jnp.ones((1, H), jnp.float32)); ln1b.append(jnp.zeros((1, H), jnp.float32))
        wi.append(nrm(next(keys), (H, F_))); bi.append(jnp.zeros((1, F_), jnp.float32))
        wo2.append(nrm(next(keys), (F_, H))); bo2.append(jnp.zeros((1, H), jnp.float32))
        ln2g.append(jnp.ones((1, H), jnp.float32)); ln2b.append(jnp.zeros((1, H), jnp.float32))

    stack_bf16 = lambda xs: jnp.stack(xs, axis=0).astype(jnp.bfloat16)  # MXU operands
    stack_f32 = lambda xs: jnp.stack(xs, axis=0)
    p.update(dict(wqkv=stack_bf16(wqkv), bqkv=stack_f32(bqkv),
                  wo=stack_bf16(wo), bo=stack_f32(bo),
                  ln1_g=stack_f32(ln1g), ln1_b=stack_f32(ln1b),
                  wi=stack_bf16(wi), bi=stack_f32(bi),
                  wo2=stack_bf16(wo2), bo2=stack_f32(bo2),
                  ln2_g=stack_f32(ln2g), ln2_b=stack_f32(ln2b)))
    return p


# ----------------------------------------------------------------------------
# Forward pass: embedding gather in JAX glue, everything else in ONE Pallas call
# ----------------------------------------------------------------------------

def _full_spec(arr):
    n = arr.ndim
    return pl.BlockSpec(arr.shape, lambda b: (0,) * n)   # constant block -> DMA'd once


def bert_class_forward(params, input_ids, input_mask, cfg):
    B, S = input_ids.shape
    H, nh, L = cfg["hidden"], cfg["heads"], cfg["layers"]
    F_, out = cfg["ff"], cfg["output_size"]
    dh = H // nh
    S_sub = min(S, cfg["subset"])      # subset=50 > S -> whole sequence

    # TODO(synk): embedding-table gather stays in JAX glue (tiny one-off XLA gather);
    # embedding / attention / hidden dropout omitted (eval-mode identity).
    emb = (params["word_emb"][input_ids]
           + params["pos_emb"][:S][None, :, :]
           + params["type_emb"][0][None, None, :]).astype(jnp.float32)   # (B, S, H)

    # additive attention mask bias over keys: (1 - mask) * -10000, shaped (B, 1, S)
    mask_bias = ((1.0 - input_mask.astype(jnp.float32)) * -10000.0)[:, None, :]

    # lane-dense packed head: [ identity(H) | fc_w | 0 ] so pooled + logit come out of
    # one (H, PACK) matmul and one unmasked 128-lane store per batch row.
    pack_w = jnp.zeros((H, PACK), jnp.float32)
    pack_w = pack_w.at[:, :H].set(jnp.eye(H, dtype=jnp.float32))
    pack_w = pack_w.at[:, H:H + out].set(params["fc_w"])
    pack_b = jnp.zeros((1, PACK), jnp.float32).at[:, H:H + out].set(params["fc_b"])

    weight_args = (params["emb_ln_g"], params["emb_ln_b"],
                   params["wqkv"], params["bqkv"], params["wo"], params["bo"],
                   params["ln1_g"], params["ln1_b"],
                   params["wi"], params["bi"], params["wo2"], params["bo2"],
                   params["ln2_g"], params["ln2_b"],
                   pack_w, pack_b)
    args = (emb, mask_bias) + weight_args

    in_specs = ([pl.BlockSpec((None, S, H), lambda b: (b, 0, 0)),      # per-batch emb
                 pl.BlockSpec((None, 1, S), lambda b: (b, 0, 0))]      # per-batch mask
                + [_full_spec(a) for a in weight_args])                # weights: block 0
    out_specs = pl.BlockSpec((None, 1, PACK), lambda b: (b, 0, 0))     # lane-dense slab

    # Advisory cost hint so XLA schedules the single custom call sensibly.
    flops = (L * B * (2 * S * H * 3 * H)                # fused QKV proj
             + L * B * nh * (2 * S * S * dh) * 2        # scores + P@V
             + L * B * (2 * S * H * H)                  # attn out proj
             + L * B * (2 * S * H * F_) * 2             # FFN in + out
             + B * 2 * H * PACK)                        # packed (pooled|logit) head
    transcendentals = L * B * (nh * S * S + S * F_) + B * S * (2 * L + 1)
    bytes_accessed = (sum(int(a.size) * a.dtype.itemsize for a in args)
                      + B * PACK * 4)

    kernel = functools.partial(_bert_fused_kernel,
                               S=S, S_sub=S_sub, H=H, nh=nh, L=L)

    packed = pl.pallas_call(
        kernel,
        out_shape=jax.ShapeDtypeStruct((B, 1, PACK), jnp.float32),
        grid=(B,),
        in_specs=in_specs,
        out_specs=out_specs,
        compiler_params=pltpu.CompilerParams(
            dimension_semantics=("parallel",)),          # v7x: one batch row per core
        cost_estimate=pl.CostEstimate(flops=flops,
                                      transcendentals=transcendentals,
                                      bytes_accessed=bytes_accessed),
    )(*args)

    packed = packed.reshape(B, PACK)
    pooled = packed[:, :H]                               # (B, H)  == self.last_hidden_state
    logits = packed[:, H:H + out]                        # (B, output_size)
    return logits, pooled


# ----------------------------------------------------------------------------
# Main
# ----------------------------------------------------------------------------

if __name__ == "__main__":
    B, S = 2, 8
    key = jax.random.PRNGKey(0)
    k_par, k_ids = jax.random.split(key)

    params = init_params(k_par, CFG)
    input_ids = jax.random.randint(k_ids, (B, S), 0, CFG["vocab"], dtype=jnp.int32)
    # mask: first sequence fully valid, second has 2 padding tokens
    input_mask = jnp.array([[1, 1, 1, 1, 1, 1, 1, 1],
                            [1, 1, 1, 1, 1, 1, 0, 0]], dtype=jnp.int32)

    fwd = jax.jit(functools.partial(bert_class_forward, cfg=CFG))
    logits, pooled = fwd(params, input_ids, input_mask)
    jax.block_until_ready((logits, pooled))

    assert logits.shape == (B, CFG["output_size"])
    assert pooled.shape == (B, CFG["hidden"])
    assert bool(jnp.all(jnp.isfinite(logits))) and bool(jnp.all(jnp.isfinite(pooled)))
    print("KERNEL_OK")
</pallas_src>

<mosaic_0001>
module attributes {stable_mosaic.version = 11 : i64} {
  func.func @_bert_fused_kernel(%arg0: i32, %arg1: memref<1x8x32xf32, #tpu.memory_space<vmem>>, %arg2: memref<1x1x8xf32, #tpu.memory_space<vmem>>, %arg3: memref<1x32xf32, #tpu.memory_space<vmem>>, %arg4: memref<1x32xf32, #tpu.memory_space<vmem>>, %arg5: memref<2x32x96xbf16, #tpu.memory_space<vmem>>, %arg6: memref<2x1x96xf32, #tpu.memory_space<vmem>>, %arg7: memref<2x32x32xbf16, #tpu.memory_space<vmem>>, %arg8: memref<2x1x32xf32, #tpu.memory_space<vmem>>, %arg9: memref<2x1x32xf32, #tpu.memory_space<vmem>>, %arg10: memref<2x1x32xf32, #tpu.memory_space<vmem>>, %arg11: memref<2x32x64xbf16, #tpu.memory_space<vmem>>, %arg12: memref<2x1x64xf32, #tpu.memory_space<vmem>>, %arg13: memref<2x64x32xbf16, #tpu.memory_space<vmem>>, %arg14: memref<2x1x32xf32, #tpu.memory_space<vmem>>, %arg15: memref<2x1x32xf32, #tpu.memory_space<vmem>>, %arg16: memref<2x1x32xf32, #tpu.memory_space<vmem>>, %arg17: memref<32x128xf32, #tpu.memory_space<vmem>>, %arg18: memref<1x128xf32, #tpu.memory_space<vmem>>, %arg19: memref<1x1x128xf32, #tpu.memory_space<vmem>>) attributes {dimension_semantics = [#tpu.dimension_semantics<parallel>], iteration_bounds = array<i64: 2>, scalar_prefetch = 0 : i64, scratch_operands = 0 : i64, tpu.core_type = #tpu.core_type<tc>, window_params = [{transform_indices = @transform_0, window_bounds = array<i64: 1, 8, 32>}, {transform_indices = @transform_1, window_bounds = array<i64: 1, 1, 8>}, {pipeline_mode = #tpu.pipeline_mode<synchronous>, transform_indices = @transform_2, window_bounds = array<i64: 1, 32>}, {pipeline_mode = #tpu.pipeline_mode<synchronous>, transform_indices = @transform_3, window_bounds = array<i64: 1, 32>}, {pipeline_mode = #tpu.pipeline_mode<synchronous>, transform_indices = @transform_4, window_bounds = array<i64: 2, 32, 96>}, {pipeline_mode = #tpu.pipeline_mode<synchronous>, transform_indices = @transform_5, window_bounds = array<i64: 2, 1, 96>}, {pipeline_mode = #tpu.pipeline_mode<synchronous>, transform_indices = @transform_6, window_bounds = array<i64: 2, 32, 32>}, {pipeline_mode = #tpu.pipeline_mode<synchronous>, transform_indices = @transform_7, window_bounds = array<i64: 2, 1, 32>}, {pipeline_mode = #tpu.pipeline_mode<synchronous>, transform_indices = @transform_8, window_bounds = array<i64: 2, 1, 32>}, {pipeline_mode = #tpu.pipeline_mode<synchronous>, transform_indices = @transform_9, window_bounds = array<i64: 2, 1, 32>}, {pipeline_mode = #tpu.pipeline_mode<synchronous>, transform_indices = @transform_10, window_bounds = array<i64: 2, 32, 64>}, {pipeline_mode = #tpu.pipeline_mode<synchronous>, transform_indices = @transform_11, window_bounds = array<i64: 2, 1, 64>}, {pipeline_mode = #tpu.pipeline_mode<synchronous>, transform_indices = @transform_12, window_bounds = array<i64: 2, 64, 32>}, {pipeline_mode = #tpu.pipeline_mode<synchronous>, transform_indices = @transform_13, window_bounds = array<i64: 2, 1, 32>}, {pipeline_mode = #tpu.pipeline_mode<synchronous>, transform_indices = @transform_14, window_bounds = array<i64: 2, 1, 32>}, {pipeline_mode = #tpu.pipeline_mode<synchronous>, transform_indices = @transform_15, window_bounds = array<i64: 2, 1, 32>}, {pipeline_mode = #tpu.pipeline_mode<synchronous>, transform_indices = @transform_16, window_bounds = array<i64: 32, 128>}, {pipeline_mode = #tpu.pipeline_mode<synchronous>, transform_indices = @transform_17, window_bounds = array<i64: 1, 128>}, {transform_indices = @transform_18, window_bounds = array<i64: 1, 1, 128>}]} {
    %c0 = arith.constant 0 : index
    %c0_0 = arith.constant 0 : index
    %c0_1 = arith.constant 0 : index
    %0 = vector.load %arg1[%c0, %c0_0, %c0_1] : memref<1x8x32xf32, #tpu.memory_space<vmem>>, vector<1x8x32xf32>
    %1 = vector.shape_cast %0 : vector<1x8x32xf32> to vector<8x32xf32>
    %c0_2 = arith.constant 0 : index
    %c0_3 = arith.constant 0 : index
    %2 = vector.load %arg3[%c0_2, %c0_3] : memref<1x32xf32, #tpu.memory_space<vmem>>, vector<1x32xf32>
    %c0_4 = arith.constant 0 : index
    %c0_5 = arith.constant 0 : index
    %3 = vector.load %arg4[%c0_4, %c0_5] : memref<1x32xf32, #tpu.memory_space<vmem>>, vector<1x32xf32>
    %cst = arith.constant dense<0.000000e+00> : vector<8xf32>
    %4 = vector.multi_reduction <add>, %1, %cst [1] : vector<8x32xf32> to vector<8xf32>
    %5 = vector.shape_cast %4 : vector<8xf32> to vector<8x1xf32>
    %cst_6 = arith.constant 3.200000e+01 : f32
    %6 = vector.broadcast %cst_6 : f32 to vector<8x1xf32>
    %7 = arith.divf %5, %6 : vector<8x1xf32>
    %8 = vector.broadcast %7 : vector<8x1xf32> to vector<8x32xf32>
    %9 = arith.subf %1, %8 : vector<8x32xf32>
    %10 = arith.mulf %9, %9 : vector<8x32xf32>
    %cst_7 = arith.constant dense<0.000000e+00> : vector<8xf32>
    %11 = vector.multi_reduction <add>, %10, %cst_7 [1] : vector<8x32xf32> to vector<8xf32>
    %12 = vector.shape_cast %11 : vector<8xf32> to vector<8x1xf32>
    %cst_8 = arith.constant 3.200000e+01 : f32
    %13 = vector.broadcast %cst_8 : f32 to vector<8x1xf32>
    %14 = arith.divf %12, %13 : vector<8x1xf32>
    %15 = vector.broadcast %7 : vector<8x1xf32> to vector<8x32xf32>
    %16 = arith.subf %1, %15 : vector<8x32xf32>
    %cst_9 = arith.constant 9.99999996E-13 : f32
    %17 = vector.broadcast %cst_9 : f32 to vector<8x1xf32>
    %18 = arith.addf %14, %17 : vector<8x1xf32>
    %19 = math.rsqrt %18 : vector<8x1xf32>
    %20 = vector.broadcast %19 : vector<8x1xf32> to vector<8x32xf32>
    %21 = arith.mulf %16, %20 : vector<8x32xf32>
    %22 = vector.broadcast %2 : vector<1x32xf32> to vector<8x32xf32>
    %23 = arith.mulf %21, %22 : vector<8x32xf32>
    %24 = vector.broadcast %3 : vector<1x32xf32> to vector<8x32xf32>
    %25 = arith.addf %23, %24 : vector<8x32xf32>
    %c0_10 = arith.constant 0 : index
    %c0_11 = arith.constant 0 : index
    %c0_12 = arith.constant 0 : index
    %26 = vector.load %arg2[%c0_10, %c0_11, %c0_12] : memref<1x1x8xf32, #tpu.memory_space<vmem>>, vector<1x1x8xf32>
    %27 = vector.shape_cast %26 : vector<1x1x8xf32> to vector<1x8xf32>
    %28 = vector.shape_cast %27 : vector<1x8xf32> to vector<1x1x8xf32>
    %29 = arith.truncf %25 : vector<8x32xf32> to vector<8x32xbf16>
    %c0_13 = arith.constant 0 : index
    %c0_14 = arith.constant 0 : index
    %c0_15 = arith.constant 0 : index
    %30 = vector.load %arg5[%c0_13, %c0_14, %c0_15] : memref<2x32x96xbf16, #tpu.memory_space<vmem>>, vector<1x32x96xbf16>
    %31 = vector.shape_cast %30 : vector<1x32x96xbf16> to vector<32x96xbf16>
    %cst_16 = arith.constant dense<0.000000e+00> : vector<8x96xf32>
    %32 = tpu.matmul %29, %31, %cst_16 {dimension_numbers = #tpu.dot_dimension_numbers<[1], [0], [0], [1], [0, 0, 1, 1], [], []>} : vector<8x32xbf16>, vector<32x96xbf16>, vector<8x96xf32> -> vector<8x96xf32>
    %c0_17 = arith.constant 0 : index
    %c0_18 = arith.constant 0 : index
    %c0_19 = arith.constant 0 : index
    %33 = vector.load %arg6[%c0_17, %c0_18, %c0_19] : memref<2x1x96xf32, #tpu.memory_space<vmem>>, vector<1x1x96xf32>
    %34 = vector.shape_cast %33 : vector<1x1x96xf32> to vector<1x96xf32>
    %35 = vector.broadcast %34 : vector<1x96xf32> to vector<8x96xf32>
    %36 = arith.addf %32, %35 : vector<8x96xf32>
    %37 = vector.extract_strided_slice %36 {offsets = [0, 0], sizes = [8, 32], strides = [1, 1]} : vector<8x96xf32> to vector<8x32xf32>
    %38 = vector.extract_strided_slice %36 {offsets = [0, 32], sizes = [8, 32], strides = [1, 1]} : vector<8x96xf32> to vector<8x32xf32>
    %39 = vector.extract_strided_slice %36 {offsets = [0, 64], sizes = [8, 32], strides = [1, 1]} : vector<8x96xf32> to vector<8x32xf32>
    %40 = vector.shape_cast %37 : vector<8x32xf32> to vector<8x4x8xf32>
    %41 = tpu.transpose %40, [1, 0, 2] : vector<8x4x8xf32> -> vector<4x8x8xf32>
    %42 = vector.shape_cast %38 : vector<8x32xf32> to vector<8x4x8xf32>
    %43 = tpu.transpose %42, [1, 0, 2] : vector<8x4x8xf32> -> vector<4x8x8xf32>
    %44 = vector.shape_cast %39 : vector<8x32xf32> to vector<8x4x8xf32>
    %45 = tpu.transpose %44, [1, 0, 2] : vector<8x4x8xf32> -> vector<4x8x8xf32>
    %46 = arith.truncf %41 : vector<4x8x8xf32> to vector<4x8x8xbf16>
    %47 = arith.truncf %43 : vector<4x8x8xf32> to vector<4x8x8xbf16>
    "tpu.trace_start"() <{level = 10 : i32, message = "hqd,hkd->hqk"}> : () -> ()
    %cst_20 = arith.constant dense<0.000000e+00> : vector<4x8x8xf32>
    %48 = tpu.matmul %46, %47, %cst_20 {dimension_numbers = #tpu.dot_dimension_numbers<[2], [2], [1], [1], [0, 0, 0, 1, 1, 1], [0], [0]>} : vector<4x8x8xbf16>, vector<4x8x8xbf16>, vector<4x8x8xf32> -> vector<4x8x8xf32>
    "tpu.trace_stop"() : () -> ()
    %cst_21 = arith.constant 0.353553385 : f32
    %49 = vector.broadcast %cst_21 : f32 to vector<4x8x8xf32>
    %50 = arith.mulf %48, %49 : vector<4x8x8xf32>
    %51 = vector.broadcast %28 : vector<1x1x8xf32> to vector<4x8x8xf32>
    %52 = arith.addf %50, %51 : vector<4x8x8xf32>
    %cst_22 = arith.constant dense<0xFF800000> : vector<4x8xf32>
    %53 = vector.multi_reduction <maximumf>, %52, %cst_22 [2] : vector<4x8x8xf32> to vector<4x8xf32>
    %54 = vector.shape_cast %53 : vector<4x8xf32> to vector<4x8x1xf32>
    %55 = vector.broadcast %54 : vector<4x8x1xf32> to vector<4x8x8xf32>
    %56 = arith.subf %52, %55 : vector<4x8x8xf32>
    %57 = math.exp %56 : vector<4x8x8xf32>
    %cst_23 = arith.constant dense<0.000000e+00> : vector<4x8xf32>
    %58 = vector.multi_reduction <add>, %57, %cst_23 [2] : vector<4x8x8xf32> to vector<4x8xf32>
    %59 = vector.shape_cast %58 : vector<4x8xf32> to vector<4x8x1xf32>
    %60 = tpu.reciprocal %59 {approx = true} : vector<4x8x1xf32> -> vector<4x8x1xf32>
    %61 = vector.broadcast %60 : vector<4x8x1xf32> to vector<4x8x8xf32>
    %62 = arith.mulf %57, %61 : vector<4x8x8xf32>
    %63 = arith.truncf %62 : vector<4x8x8xf32> to vector<4x8x8xbf16>
    %64 = arith.truncf %45 : vector<4x8x8xf32> to vector<4x8x8xbf16>
    "tpu.trace_start"() <{level = 10 : i32, message = "hqk,hkd->hqd"}> : () -> ()
    %cst_24 = arith.constant dense<0.000000e+00> : vector<4x8x8xf32>
    %65 = tpu.matmul %63, %64, %cst_24 {dimension_numbers = #tpu.dot_dimension_numbers<[2], [1], [1], [2], [0, 0, 0, 1, 1, 2], [0], [0]>} : vector<4x8x8xbf16>, vector<4x8x8xbf16>, vector<4x8x8xf32> -> vector<4x8x8xf32>
    "tpu.trace_stop"() : () -> ()
    %66 = tpu.transpose %65, [1, 0, 2] : vector<4x8x8xf32> -> vector<8x4x8xf32>
    %67 = vector.shape_cast %66 : vector<8x4x8xf32> to vector<8x32xf32>
    %68 = arith.truncf %67 : vector<8x32xf32> to vector<8x32xbf16>
    %c0_25 = arith.constant 0 : index
    %c0_26 = arith.constant 0 : index
    %c0_27 = arith.constant 0 : index
    %69 = vector.load %arg7[%c0_25, %c0_26, %c0_27] : memref<2x32x32xbf16, #tpu.memory_space<vmem>>, vector<1x32x32xbf16>
    %70 = vector.shape_cast %69 : vector<1x32x32xbf16> to vector<32x32xbf16>
    %cst_28 = arith.constant dense<0.000000e+00> : vector<8x32xf32>
    %71 = tpu.matmul %68, %70, %cst_28 {dimension_numbers = #tpu.dot_dimension_numbers<[1], [0], [0], [1], [0, 0, 1, 1], [], []>} : vector<8x32xbf16>, vector<32x32xbf16>, vector<8x32xf32> -> vector<8x32xf32>
    %c0_29 = arith.constant 0 : index
    %c0_30 = arith.constant 0 : index
    %c0_31 = arith.constant 0 : index
    %72 = vector.load %arg8[%c0_29, %c0_30, %c0_31] : memref<2x1x32xf32, #tpu.memory_space<vmem>>, vector<1x1x32xf32>
    %73 = vector.shape_cast %72 : vector<1x1x32xf32> to vector<1x32xf32>
    %74 = vector.broadcast %73 : vector<1x32xf32> to vector<8x32xf32>
    %75 = arith.addf %71, %74 : vector<8x32xf32>
    %76 = arith.addf %75, %25 : vector<8x32xf32>
    %c0_32 = arith.constant 0 : index
    %c0_33 = arith.constant 0 : index
    %c0_34 = arith.constant 0 : index
    %77 = vector.load %arg9[%c0_32, %c0_33, %c0_34] : memref<2x1x32xf32, #tpu.memory_space<vmem>>, vector<1x1x32xf32>
    %78 = vector.shape_cast %77 : vector<1x1x32xf32> to vector<1x32xf32>
    %c0_35 = arith.constant 0 : index
    %c0_36 = arith.constant 0 : index
    %c0_37 = arith.constant 0 : index
    %79 = vector.load %arg10[%c0_35, %c0_36, %c0_37] : memref<2x1x32xf32, #tpu.memory_space<vmem>>, vector<1x1x32xf32>
    %80 = vector.shape_cast %79 : vector<1x1x32xf32> to vector<1x32xf32>
    %cst_38 = arith.constant dense<0.000000e+00> : vector<8xf32>
    %81 = vector.multi_reduction <add>, %76, %cst_38 [1] : vector<8x32xf32> to vector<8xf32>
    %82 = vector.shape_cast %81 : vector<8xf32> to vector<8x1xf32>
    %cst_39 = arith.constant 3.200000e+01 : f32
    %83 = vector.broadcast %cst_39 : f32 to vector<8x1xf32>
    %84 = arith.divf %82, %83 : vector<8x1xf32>
    %85 = vector.broadcast %84 : vector<8x1xf32> to vector<8x32xf32>
    %86 = arith.subf %76, %85 : vector<8x32xf32>
    %87 = arith.mulf %86, %86 : vector<8x32xf32>
    %cst_40 = arith.constant dense<0.000000e+00> : vector<8xf32>
    %88 = vector.multi_reduction <add>, %87, %cst_40 [1] : vector<8x32xf32> to vector<8xf32>
    %89 = vector.shape_cast %88 : vector<8xf32> to vector<8x1xf32>
    %cst_41 = arith.constant 3.200000e+01 : f32
    %90 = vector.broadcast %cst_41 : f32 to vector<8x1xf32>
    %91 = arith.divf %89, %90 : vector<8x1xf32>
    %92 = vector.broadcast %84 : vector<8x1xf32> to vector<8x32xf32>
    %93 = arith.subf %76, %92 : vector<8x32xf32>
    %cst_42 = arith.constant 9.99999996E-13 : f32
    %94 = vector.broadcast %cst_42 : f32 to vector<8x1xf32>
    %95 = arith.addf %91, %94 : vector<8x1xf32>
    %96 = math.rsqrt %95 : vector<8x1xf32>
    %97 = vector.broadcast %96 : vector<8x1xf32> to vector<8x32xf32>
    %98 = arith.mulf %93, %97 : vector<8x32xf32>
    %99 = vector.broadcast %78 : vector<1x32xf32> to vector<8x32xf32>
    %100 = arith.mulf %98, %99 : vector<8x32xf32>
    %101 = vector.broadcast %80 : vector<1x32xf32> to vector<8x32xf32>
    %102 = arith.addf %100, %101 : vector<8x32xf32>
    %103 = arith.truncf %102 : vector<8x32xf32> to vector<8x32xbf16>
    %c0_43 = arith.constant 0 : index
    %c0_44 = arith.constant 0 : index
    %c0_45 = arith.constant 0 : index
    %104 = vector.load %arg11[%c0_43, %c0_44, %c0_45] : memref<2x32x64xbf16, #tpu.memory_space<vmem>>, vector<1x32x64xbf16>
    %105 = vector.shape_cast %104 : vector<1x32x64xbf16> to vector<32x64xbf16>
    %cst_46 = arith.constant dense<0.000000e+00> : vector<8x64xf32>
    %106 = tpu.matmul %103, %105, %cst_46 {dimension_numbers = #tpu.dot_dimension_numbers<[1], [0], [0], [1], [0, 0, 1, 1], [], []>} : vector<8x32xbf16>, vector<32x64xbf16>, vector<8x64xf32> -> vector<8x64xf32>
    %c0_47 = arith.constant 0 : index
    %c0_48 = arith.constant 0 : index
    %c0_49 = arith.constant 0 : index
    %107 = vector.load %arg12[%c0_47, %c0_48, %c0_49] : memref<2x1x64xf32, #tpu.memory_space<vmem>>, vector<1x1x64xf32>
    %108 = vector.shape_cast %107 : vector<1x1x64xf32> to vector<1x64xf32>
    %109 = vector.broadcast %108 : vector<1x64xf32> to vector<8x64xf32>
    %110 = arith.addf %106, %109 : vector<8x64xf32>
    %111 = arith.mulf %110, %110 : vector<8x64xf32>
    %112 = arith.mulf %110, %111 : vector<8x64xf32>
    %cst_50 = arith.constant 4.471500e-02 : f32
    %113 = vector.broadcast %cst_50 : f32 to vector<8x64xf32>
    %114 = arith.mulf %113, %112 : vector<8x64xf32>
    %115 = arith.addf %110, %114 : vector<8x64xf32>
    %cst_51 = arith.constant 0.797884583 : f32
    %116 = vector.broadcast %cst_51 : f32 to vector<8x64xf32>
    %117 = arith.mulf %116, %115 : vector<8x64xf32>
    %118 = math.tanh %117 : vector<8x64xf32>
    %cst_52 = arith.constant 1.000000e+00 : f32
    %119 = vector.broadcast %cst_52 : f32 to vector<8x64xf32>
    %120 = arith.addf %119, %118 : vector<8x64xf32>
    %cst_53 = arith.constant 5.000000e-01 : f32
    %121 = vector.broadcast %cst_53 : f32 to vector<8x64xf32>
    %122 = arith.mulf %121, %120 : vector<8x64xf32>
    %123 = arith.mulf %110, %122 : vector<8x64xf32>
    %124 = arith.truncf %123 : vector<8x64xf32> to vector<8x64xbf16>
    %c0_54 = arith.constant 0 : index
    %c0_55 = arith.constant 0 : index
    %c0_56 = arith.constant 0 : index
    %125 = vector.load %arg13[%c0_54, %c0_55, %c0_56] : memref<2x64x32xbf16, #tpu.memory_space<vmem>>, vector<1x64x32xbf16>
    %126 = vector.shape_cast %125 : vector<1x64x32xbf16> to vector<64x32xbf16>
    %cst_57 = arith.constant dense<0.000000e+00> : vector<8x32xf32>
    %127 = tpu.matmul %124, %126, %cst_57 {dimension_numbers = #tpu.dot_dimension_numbers<[1], [0], [0], [1], [0, 0, 1, 1], [], []>} : vector<8x64xbf16>, vector<64x32xbf16>, vector<8x32xf32> -> vector<8x32xf32>
    %c0_58 = arith.constant 0 : index
    %c0_59 = arith.constant 0 : index
    %c0_60 = arith.constant 0 : index
    %128 = vector.load %arg14[%c0_58, %c0_59, %c0_60] : memref<2x1x32xf32, #tpu.memory_space<vmem>>, vector<1x1x32xf32>
    %129 = vector.shape_cast %128 : vector<1x1x32xf32> to vector<1x32xf32>
    %130 = vector.broadcast %129 : vector<1x32xf32> to vector<8x32xf32>
    %131 = arith.addf %127, %130 : vector<8x32xf32>
    %132 = arith.addf %131, %102 : vector<8x32xf32>
    %c0_61 = arith.constant 0 : index
    %c0_62 = arith.constant 0 : index
    %c0_63 = arith.constant 0 : index
    %133 = vector.load %arg15[%c0_61, %c0_62, %c0_63] : memref<2x1x32xf32, #tpu.memory_space<vmem>>, vector<1x1x32xf32>
    %134 = vector.shape_cast %133 : vector<1x1x32xf32> to vector<1x32xf32>
    %c0_64 = arith.constant 0 : index
    %c0_65 = arith.constant 0 : index
    %c0_66 = arith.constant 0 : index
    %135 = vector.load %arg16[%c0_64, %c0_65, %c0_66] : memref<2x1x32xf32, #tpu.memory_space<vmem>>, vector<1x1x32xf32>
    %136 = vector.shape_cast %135 : vector<1x1x32xf32> to vector<1x32xf32>
    %cst_67 = arith.constant dense<0.000000e+00> : vector<8xf32>
    %137 = vector.multi_reduction <add>, %132, %cst_67 [1] : vector<8x32xf32> to vector<8xf32>
    %138 = vector.shape_cast %137 : vector<8xf32> to vector<8x1xf32>
    %cst_68 = arith.constant 3.200000e+01 : f32
    %139 = vector.broadcast %cst_68 : f32 to vector<8x1xf32>
    %140 = arith.divf %138, %139 : vector<8x1xf32>
    %141 = vector.broadcast %140 : vector<8x1xf32> to vector<8x32xf32>
    %142 = arith.subf %132, %141 : vector<8x32xf32>
    %143 = arith.mulf %142, %142 : vector<8x32xf32>
    %cst_69 = arith.constant dense<0.000000e+00> : vector<8xf32>
    %144 = vector.multi_reduction <add>, %143, %cst_69 [1] : vector<8x32xf32> to vector<8xf32>
    %145 = vector.shape_cast %144 : vector<8xf32> to vector<8x1xf32>
    %cst_70 = arith.constant 3.200000e+01 : f32
    %146 = vector.broadcast %cst_70 : f32 to vector<8x1xf32>
    %147 = arith.divf %145, %146 : vector<8x1xf32>
    %148 = vector.broadcast %140 : vector<8x1xf32> to vector<8x32xf32>
    %149 = arith.subf %132, %148 : vector<8x32xf32>
    %cst_71 = arith.constant 9.99999996E-13 : f32
    %150 = vector.broadcast %cst_71 : f32 to vector<8x1xf32>
    %151 = arith.addf %147, %150 : vector<8x1xf32>
    %152 = math.rsqrt %151 : vector<8x1xf32>
    %153 = vector.broadcast %152 : vector<8x1xf32> to vector<8x32xf32>
    %154 = arith.mulf %149, %153 : vector<8x32xf32>
    %155 = vector.broadcast %134 : vector<1x32xf32> to vector<8x32xf32>
    %156 = arith.mulf %154, %155 : vector<8x32xf32>
    %157 = vector.broadcast %136 : vector<1x32xf32> to vector<8x32xf32>
    %158 = arith.addf %156, %157 : vector<8x32xf32>
    %159 = arith.truncf %158 : vector<8x32xf32> to vector<8x32xbf16>
    %c1 = arith.constant 1 : index
    %c0_72 = arith.constant 0 : index
    %c0_73 = arith.constant 0 : index
    %160 = vector.load %arg5[%c1, %c0_72, %c0_73] : memref<2x32x96xbf16, #tpu.memory_space<vmem>>, vector<1x32x96xbf16>
    %161 = vector.shape_cast %160 : vector<1x32x96xbf16> to vector<32x96xbf16>
    %cst_74 = arith.constant dense<0.000000e+00> : vector<8x96xf32>
    %162 = tpu.matmul %159, %161, %cst_74 {dimension_numbers = #tpu.dot_dimension_numbers<[1], [0], [0], [1], [0, 0, 1, 1], [], []>} : vector<8x32xbf16>, vector<32x96xbf16>, vector<8x96xf32> -> vector<8x96xf32>
    %c1_75 = arith.constant 1 : index
    %c0_76 = arith.constant 0 : index
    %c0_77 = arith.constant 0 : index
    %163 = vector.load %arg6[%c1_75, %c0_76, %c0_77] : memref<2x1x96xf32, #tpu.memory_space<vmem>>, vector<1x1x96xf32>
    %164 = vector.shape_cast %163 : vector<1x1x96xf32> to vector<1x96xf32>
    %165 = vector.broadcast %164 : vector<1x96xf32> to vector<8x96xf32>
    %166 = arith.addf %162, %165 : vector<8x96xf32>
    %167 = vector.extract_strided_slice %166 {offsets = [0, 0], sizes = [8, 32], strides = [1, 1]} : vector<8x96xf32> to vector<8x32xf32>
    %168 = vector.extract_strided_slice %166 {offsets = [0, 32], sizes = [8, 32], strides = [1, 1]} : vector<8x96xf32> to vector<8x32xf32>
    %169 = vector.extract_strided_slice %166 {offsets = [0, 64], sizes = [8, 32], strides = [1, 1]} : vector<8x96xf32> to vector<8x32xf32>
    %170 = vector.shape_cast %167 : vector<8x32xf32> to vector<8x4x8xf32>
    %171 = tpu.transpose %170, [1, 0, 2] : vector<8x4x8xf32> -> vector<4x8x8xf32>
    %172 = vector.shape_cast %168 : vector<8x32xf32> to vector<8x4x8xf32>
    %173 = tpu.transpose %172, [1, 0, 2] : vector<8x4x8xf32> -> vector<4x8x8xf32>
    %174 = vector.shape_cast %169 : vector<8x32xf32> to vector<8x4x8xf32>
    %175 = tpu.transpose %174, [1, 0, 2] : vector<8x4x8xf32> -> vector<4x8x8xf32>
    %176 = arith.truncf %171 : vector<4x8x8xf32> to vector<4x8x8xbf16>
    %177 = arith.truncf %173 : vector<4x8x8xf32> to vector<4x8x8xbf16>
    "tpu.trace_start"() <{level = 10 : i32, message = "hqd,hkd->hqk"}> : () -> ()
    %cst_78 = arith.constant dense<0.000000e+00> : vector<4x8x8xf32>
    %178 = tpu.matmul %176, %177, %cst_78 {dimension_numbers = #tpu.dot_dimension_numbers<[2], [2], [1], [1], [0, 0, 0, 1, 1, 1], [0], [0]>} : vector<4x8x8xbf16>, vector<4x8x8xbf16>, vector<4x8x8xf32> -> vector<4x8x8xf32>
    "tpu.trace_stop"() : () -> ()
    %cst_79 = arith.constant 0.353553385 : f32
    %179 = vector.broadcast %cst_79 : f32 to vector<4x8x8xf32>
    %180 = arith.mulf %178, %179 : vector<4x8x8xf32>
    %181 = vector.broadcast %28 : vector<1x1x8xf32> to vector<4x8x8xf32>
    %182 = arith.addf %180, %181 : vector<4x8x8xf32>
    %cst_80 = arith.constant dense<0xFF800000> : vector<4x8xf32>
    %183 = vector.multi_reduction <maximumf>, %182, %cst_80 [2] : vector<4x8x8xf32> to vector<4x8xf32>
    %184 = vector.shape_cast %183 : vector<4x8xf32> to vector<4x8x1xf32>
    %185 = vector.broadcast %184 : vector<4x8x1xf32> to vector<4x8x8xf32>
    %186 = arith.subf %182, %185 : vector<4x8x8xf32>
    %187 = math.exp %186 : vector<4x8x8xf32>
    %cst_81 = arith.constant dense<0.000000e+00> : vector<4x8xf32>
    %188 = vector.multi_reduction <add>, %187, %cst_81 [2] : vector<4x8x8xf32> to vector<4x8xf32>
    %189 = vector.shape_cast %188 : vector<4x8xf32> to vector<4x8x1xf32>
    %190 = tpu.reciprocal %189 {approx = true} : vector<4x8x1xf32> -> vector<4x8x1xf32>
    %191 = vector.broadcast %190 : vector<4x8x1xf32> to vector<4x8x8xf32>
    %192 = arith.mulf %187, %191 : vector<4x8x8xf32>
    %193 = arith.truncf %192 : vector<4x8x8xf32> to vector<4x8x8xbf16>
    %194 = arith.truncf %175 : vector<4x8x8xf32> to vector<4x8x8xbf16>
    "tpu.trace_start"() <{level = 10 : i32, message = "hqk,hkd->hqd"}> : () -> ()
    %cst_82 = arith.constant dense<0.000000e+00> : vector<4x8x8xf32>
    %195 = tpu.matmul %193, %194, %cst_82 {dimension_numbers = #tpu.dot_dimension_numbers<[2], [1], [1], [2], [0, 0, 0, 1, 1, 2], [0], [0]>} : vector<4x8x8xbf16>, vector<4x8x8xbf16>, vector<4x8x8xf32> -> vector<4x8x8xf32>
    "tpu.trace_stop"() : () -> ()
    %196 = tpu.transpose %195, [1, 0, 2] : vector<4x8x8xf32> -> vector<8x4x8xf32>
    %197 = vector.shape_cast %196 : vector<8x4x8xf32> to vector<8x32xf32>
    %198 = arith.truncf %197 : vector<8x32xf32> to vector<8x32xbf16>
    %c1_83 = arith.constant 1 : index
    %c0_84 = arith.constant 0 : index
    %c0_85 = arith.constant 0 : index
    %199 = vector.load %arg7[%c1_83, %c0_84, %c0_85] : memref<2x32x32xbf16, #tpu.memory_space<vmem>>, vector<1x32x32xbf16>
    %200 = vector.shape_cast %199 : vector<1x32x32xbf16> to vector<32x32xbf16>
    %cst_86 = arith.constant dense<0.000000e+00> : vector<8x32xf32>
    %201 = tpu.matmul %198, %200, %cst_86 {dimension_numbers = #tpu.dot_dimension_numbers<[1], [0], [0], [1], [0, 0, 1, 1], [], []>} : vector<8x32xbf16>, vector<32x32xbf16>, vector<8x32xf32> -> vector<8x32xf32>
    %c1_87 = arith.constant 1 : index
    %c0_88 = arith.constant 0 : index
    %c0_89 = arith.constant 0 : index
    %202 = vector.load %arg8[%c1_87, %c0_88, %c0_89] : memref<2x1x32xf32, #tpu.memory_space<vmem>>, vector<1x1x32xf32>
    %203 = vector.shape_cast %202 : vector<1x1x32xf32> to vector<1x32xf32>
    %204 = vector.broadcast %203 : vector<1x32xf32> to vector<8x32xf32>
    %205 = arith.addf %201, %204 : vector<8x32xf32>
    %206 = arith.addf %205, %158 : vector<8x32xf32>
    %c1_90 = arith.constant 1 : index
    %c0_91 = arith.constant 0 : index
    %c0_92 = arith.constant 0 : index
    %207 = vector.load %arg9[%c1_90, %c0_91, %c0_92] : memref<2x1x32xf32, #tpu.memory_space<vmem>>, vector<1x1x32xf32>
    %208 = vector.shape_cast %207 : vector<1x1x32xf32> to vector<1x32xf32>
    %c1_93 = arith.constant 1 : index
    %c0_94 = arith.constant 0 : index
    %c0_95 = arith.constant 0 : index
    %209 = vector.load %arg10[%c1_93, %c0_94, %c0_95] : memref<2x1x32xf32, #tpu.memory_space<vmem>>, vector<1x1x32xf32>
    %210 = vector.shape_cast %209 : vector<1x1x32xf32> to vector<1x32xf32>
    %cst_96 = arith.constant dense<0.000000e+00> : vector<8xf32>
    %211 = vector.multi_reduction <add>, %206, %cst_96 [1] : vector<8x32xf32> to vector<8xf32>
    %212 = vector.shape_cast %211 : vector<8xf32> to vector<8x1xf32>
    %cst_97 = arith.constant 3.200000e+01 : f32
    %213 = vector.broadcast %cst_97 : f32 to vector<8x1xf32>
    %214 = arith.divf %212, %213 : vector<8x1xf32>
    %215 = vector.broadcast %214 : vector<8x1xf32> to vector<8x32xf32>
    %216 = arith.subf %206, %215 : vector<8x32xf32>
    %217 = arith.mulf %216, %216 : vector<8x32xf32>
    %cst_98 = arith.constant dense<0.000000e+00> : vector<8xf32>
    %218 = vector.multi_reduction <add>, %217, %cst_98 [1] : vector<8x32xf32> to vector<8xf32>
    %219 = vector.shape_cast %218 : vector<8xf32> to vector<8x1xf32>
    %cst_99 = arith.constant 3.200000e+01 : f32
    %220 = vector.broadcast %cst_99 : f32 to vector<8x1xf32>
    %221 = arith.divf %219, %220 : vector<8x1xf32>
    %222 = vector.broadcast %214 : vector<8x1xf32> to vector<8x32xf32>
    %223 = arith.subf %206, %222 : vector<8x32xf32>
    %cst_100 = arith.constant 9.99999996E-13 : f32
    %224 = vector.broadcast %cst_100 : f32 to vector<8x1xf32>
    %225 = arith.addf %221, %224 : vector<8x1xf32>
    %226 = math.rsqrt %225 : vector<8x1xf32>
    %227 = vector.broadcast %226 : vector<8x1xf32> to vector<8x32xf32>
    %228 = arith.mulf %223, %227 : vector<8x32xf32>
    %229 = vector.broadcast %208 : vector<1x32xf32> to vector<8x32xf32>
    %230 = arith.mulf %228, %229 : vector<8x32xf32>
    %231 = vector.broadcast %210 : vector<1x32xf32> to vector<8x32xf32>
    %232 = arith.addf %230, %231 : vector<8x32xf32>
    %233 = arith.truncf %232 : vector<8x32xf32> to vector<8x32xbf16>
    %c1_101 = arith.constant 1 : index
    %c0_102 = arith.constant 0 : index
    %c0_103 = arith.constant 0 : index
    %234 = vector.load %arg11[%c1_101, %c0_102, %c0_103] : memref<2x32x64xbf16, #tpu.memory_space<vmem>>, vector<1x32x64xbf16>
    %235 = vector.shape_cast %234 : vector<1x32x64xbf16> to vector<32x64xbf16>
    %cst_104 = arith.constant dense<0.000000e+00> : vector<8x64xf32>
    %236 = tpu.matmul %233, %235, %cst_104 {dimension_numbers = #tpu.dot_dimension_numbers<[1], [0], [0], [1], [0, 0, 1, 1], [], []>} : vector<8x32xbf16>, vector<32x64xbf16>, vector<8x64xf32> -> vector<8x64xf32>
    %c1_105 = arith.constant 1 : index
    %c0_106 = arith.constant 0 : index
    %c0_107 = arith.constant 0 : index
    %237 = vector.load %arg12[%c1_105, %c0_106, %c0_107] : memref<2x1x64xf32, #tpu.memory_space<vmem>>, vector<1x1x64xf32>
    %238 = vector.shape_cast %237 : vector<1x1x64xf32> to vector<1x64xf32>
    %239 = vector.broadcast %238 : vector<1x64xf32> to vector<8x64xf32>
    %240 = arith.addf %236, %239 : vector<8x64xf32>
    %241 = arith.mulf %240, %240 : vector<8x64xf32>
    %242 = arith.mulf %240, %241 : vector<8x64xf32>
    %cst_108 = arith.constant 4.471500e-02 : f32
    %243 = vector.broadcast %cst_108 : f32 to vector<8x64xf32>
    %244 = arith.mulf %243, %242 : vector<8x64xf32>
    %245 = arith.addf %240, %244 : vector<8x64xf32>
    %cst_109 = arith.constant 0.797884583 : f32
    %246 = vector.broadcast %cst_109 : f32 to vector<8x64xf32>
    %247 = arith.mulf %246, %245 : vector<8x64xf32>
    %248 = math.tanh %247 : vector<8x64xf32>
    %cst_110 = arith.constant 1.000000e+00 : f32
    %249 = vector.broadcast %cst_110 : f32 to vector<8x64xf32>
    %250 = arith.addf %249, %248 : vector<8x64xf32>
    %cst_111 = arith.constant 5.000000e-01 : f32
    %251 = vector.broadcast %cst_111 : f32 to vector<8x64xf32>
    %252 = arith.mulf %251, %250 : vector<8x64xf32>
    %253 = arith.mulf %240, %252 : vector<8x64xf32>
    %254 = arith.truncf %253 : vector<8x64xf32> to vector<8x64xbf16>
    %c1_112 = arith.constant 1 : index
    %c0_113 = arith.constant 0 : index
    %c0_114 = arith.constant 0 : index
    %255 = vector.load %arg13[%c1_112, %c0_113, %c0_114] : memref<2x64x32xbf16, #tpu.memory_space<vmem>>, vector<1x64x32xbf16>
    %256 = vector.shape_cast %255 : vector<1x64x32xbf16> to vector<64x32xbf16>
    %cst_115 = arith.constant dense<0.000000e+00> : vector<8x32xf32>
    %257 = tpu.matmul %254, %256, %cst_115 {dimension_numbers = #tpu.dot_dimension_numbers<[1], [0], [0], [1], [0, 0, 1, 1], [], []>} : vector<8x64xbf16>, vector<64x32xbf16>, vector<8x32xf32> -> vector<8x32xf32>
    %c1_116 = arith.constant 1 : index
    %c0_117 = arith.constant 0 : index
    %c0_118 = arith.constant 0 : index
    %258 = vector.load %arg14[%c1_116, %c0_117, %c0_118] : memref<2x1x32xf32, #tpu.memory_space<vmem>>, vector<1x1x32xf32>
    %259 = vector.shape_cast %258 : vector<1x1x32xf32> to vector<1x32xf32>
    %260 = vector.broadcast %259 : vector<1x32xf32> to vector<8x32xf32>
    %261 = arith.addf %257, %260 : vector<8x32xf32>
    %262 = arith.addf %261, %232 : vector<8x32xf32>
    %c1_119 = arith.constant 1 : index
    %c0_120 = arith.constant 0 : index
    %c0_121 = arith.constant 0 : index
    %263 = vector.load %arg15[%c1_119, %c0_120, %c0_121] : memref<2x1x32xf32, #tpu.memory_space<vmem>>, vector<1x1x32xf32>
    %264 = vector.shape_cast %263 : vector<1x1x32xf32> to vector<1x32xf32>
    %c1_122 = arith.constant 1 : index
    %c0_123 = arith.constant 0 : index
    %c0_124 = arith.constant 0 : index
    %265 = vector.load %arg16[%c1_122, %c0_123, %c0_124] : memref<2x1x32xf32, #tpu.memory_space<vmem>>, vector<1x1x32xf32>
    %266 = vector.shape_cast %265 : vector<1x1x32xf32> to vector<1x32xf32>
    %cst_125 = arith.constant dense<0.000000e+00> : vector<8xf32>
    %267 = vector.multi_reduction <add>, %262, %cst_125 [1] : vector<8x32xf32> to vector<8xf32>
    %268 = vector.shape_cast %267 : vector<8xf32> to vector<8x1xf32>
    %cst_126 = arith.constant 3.200000e+01 : f32
    %269 = vector.broadcast %cst_126 : f32 to vector<8x1xf32>
    %270 = arith.divf %268, %269 : vector<8x1xf32>
    %271 = vector.broadcast %270 : vector<8x1xf32> to vector<8x32xf32>
    %272 = arith.subf %262, %271 : vector<8x32xf32>
    %273 = arith.mulf %272, %272 : vector<8x32xf32>
    %cst_127 = arith.constant dense<0.000000e+00> : vector<8xf32>
    %274 = vector.multi_reduction <add>, %273, %cst_127 [1] : vector<8x32xf32> to vector<8xf32>
    %275 = vector.shape_cast %274 : vector<8xf32> to vector<8x1xf32>
    %cst_128 = arith.constant 3.200000e+01 : f32
    %276 = vector.broadcast %cst_128 : f32 to vector<8x1xf32>
    %277 = arith.divf %275, %276 : vector<8x1xf32>
    %278 = vector.broadcast %270 : vector<8x1xf32> to vector<8x32xf32>
    %279 = arith.subf %262, %278 : vector<8x32xf32>
    %cst_129 = arith.constant 9.99999996E-13 : f32
    %280 = vector.broadcast %cst_129 : f32 to vector<8x1xf32>
    %281 = arith.addf %277, %280 : vector<8x1xf32>
    %282 = math.rsqrt %281 : vector<8x1xf32>
    %283 = vector.broadcast %282 : vector<8x1xf32> to vector<8x32xf32>
    %284 = arith.mulf %279, %283 : vector<8x32xf32>
    %285 = vector.broadcast %264 : vector<1x32xf32> to vector<8x32xf32>
    %286 = arith.mulf %284, %285 : vector<8x32xf32>
    %287 = vector.broadcast %266 : vector<1x32xf32> to vector<8x32xf32>
    %288 = arith.addf %286, %287 : vector<8x32xf32>
    %cst_130 = arith.constant dense<0.000000e+00> : vector<32xf32>
    %289 = vector.multi_reduction <add>, %288, %cst_130 [0] : vector<8x32xf32> to vector<32xf32>
    %290 = vector.shape_cast %289 : vector<32xf32> to vector<1x32xf32>
    %cst_131 = arith.constant 8.000000e+00 : f32
    %291 = vector.broadcast %cst_131 : f32 to vector<1x32xf32>
    %292 = arith.divf %290, %291 : vector<1x32xf32>
    %c0_132 = arith.constant 0 : index
    %c0_133 = arith.constant 0 : index
    %293 = vector.load %arg17[%c0_132, %c0_133] : memref<32x128xf32, #tpu.memory_space<vmem>>, vector<32x128xf32>
    %cst_134 = arith.constant dense<0.000000e+00> : vector<1x128xf32>
    %294 = tpu.matmul %292, %293, %cst_134 {dimension_numbers = #tpu.dot_dimension_numbers<[1], [0], [0], [1], [0, 0, 1, 1], [], []>} : vector<1x32xf32>, vector<32x128xf32>, vector<1x128xf32> -> vector<1x128xf32>
    %c0_135 = arith.constant 0 : index
    %c0_136 = arith.constant 0 : index
    %295 = vector.load %arg18[%c0_135, %c0_136] : memref<1x128xf32, #tpu.memory_space<vmem>>, vector<1x128xf32>
    %296 = arith.addf %294, %295 : vector<1x128xf32>
    %c0_137 = arith.constant 0 : index
    %c0_138 = arith.constant 0 : index
    %c0_139 = arith.constant 0 : index
    %297 = vector.load %arg19[%c0_137, %c0_138, %c0_139] : memref<1x1x128xf32, #tpu.memory_space<vmem>>, vector<1x1x128xf32>
    %298 = vector.shape_cast %297 : vector<1x1x128xf32> to vector<1x128xf32>
    %299 = vector.shape_cast %296 : vector<1x128xf32> to vector<1x1x128xf32>
    tpu.vector_store %arg19[%c0_137, %c0_138, %c0_139], %299 {strides = array<i32>} : memref<1x1x128xf32, #tpu.memory_space<vmem>>, vector<1x1x128xf32>,
    return
  }
  func.func @transform_0(%arg0: i32) -> (i32, i32, i32) {
    %c0_i32 = arith.constant 0 : i32
    %c0_i32_0 = arith.constant 0 : i32
    %c0_i32_1 = arith.constant 0 : i32
    return %arg0, %c0_i32, %c0_i32_0 : i32, i32, i32
  }
  func.func @transform_1(%arg0: i32) -> (i32, i32, i32) {
    %c0_i32 = arith.constant 0 : i32
    %c0_i32_0 = arith.constant 0 : i32
    %c0_i32_1 = arith.constant 0 : i32
    return %arg0, %c0_i32, %c0_i32_0 : i32, i32, i32
  }
  func.func @transform_2(%arg0: i32) -> (i32, i32) {
    %c0_i32 = arith.constant 0 : i32
    %c0_i32_0 = arith.constant 0 : i32
    %c0_i32_1 = arith.constant 0 : i32
    return %c0_i32, %c0_i32_0 : i32, i32
  }
  func.func @transform_3(%arg0: i32) -> (i32, i32) {
    %c0_i32 = arith.constant 0 : i32
    %c0_i32_0 = arith.constant 0 : i32
    %c0_i32_1 = arith.constant 0 : i32
    return %c0_i32, %c0_i32_0 : i32, i32
  }
  func.func @transform_4(%arg0: i32) -> (i32, i32, i32) {
    %c0_i32 = arith.constant 0 : i32
    %c0_i32_0 = arith.constant 0 : i32
    %c0_i32_1 = arith.constant 0 : i32
    %c0_i32_2 = arith.constant 0 : i32
    return %c0_i32, %c0_i32_0, %c0_i32_1 : i32, i32, i32
  }
  func.func @transform_5(%arg0: i32) -> (i32, i32, i32) {
    %c0_i32 = arith.constant 0 : i32
    %c0_i32_0 = arith.constant 0 : i32
    %c0_i32_1 = arith.constant 0 : i32
    %c0_i32_2 = arith.constant 0 : i32
    return %c0_i32, %c0_i32_0, %c0_i32_1 : i32, i32, i32
  }
  func.func @transform_6(%arg0: i32) -> (i32, i32, i32) {
    %c0_i32 = arith.constant 0 : i32
    %c0_i32_0 = arith.constant 0 : i32
    %c0_i32_1 = arith.constant 0 : i32
    %c0_i32_2 = arith.constant 0 : i32
    return %c0_i32, %c0_i32_0, %c0_i32_1 : i32, i32, i32
  }
  func.func @transform_7(%arg0: i32) -> (i32, i32, i32) {
    %c0_i32 = arith.constant 0 : i32
    %c0_i32_0 = arith.constant 0 : i32
    %c0_i32_1 = arith.constant 0 : i32
    %c0_i32_2 = arith.constant 0 : i32
    return %c0_i32, %c0_i32_0, %c0_i32_1 : i32, i32, i32
  }
  func.func @transform_8(%arg0: i32) -> (i32, i32, i32) {
    %c0_i32 = arith.constant 0 : i32
    %c0_i32_0 = arith.constant 0 : i32
    %c0_i32_1 = arith.constant 0 : i32
    %c0_i32_2 = arith.constant 0 : i32
    return %c0_i32, %c0_i32_0, %c0_i32_1 : i32, i32, i32
  }
  func.func @transform_9(%arg0: i32) -> (i32, i32, i32) {
    %c0_i32 = arith.constant 0 : i32
    %c0_i32_0 = arith.constant 0 : i32
    %c0_i32_1 = arith.constant 0 : i32
    %c0_i32_2 = arith.constant 0 : i32
    return %c0_i32, %c0_i32_0, %c0_i32_1 : i32, i32, i32
  }
  func.func @transform_10(%arg0: i32) -> (i32, i32, i32) {
    %c0_i32 = arith.constant 0 : i32
    %c0_i32_0 = arith.constant 0 : i32
    %c0_i32_1 = arith.constant 0 : i32
    %c0_i32_2 = arith.constant 0 : i32
    return %c0_i32, %c0_i32_0, %c0_i32_1 : i32, i32, i32
  }
  func.func @transform_11(%arg0: i32) -> (i32, i32, i32) {
    %c0_i32 = arith.constant 0 : i32
    %c0_i32_0 = arith.constant 0 : i32
    %c0_i32_1 = arith.constant 0 : i32
    %c0_i32_2 = arith.constant 0 : i32
    return %c0_i32, %c0_i32_0, %c0_i32_1 : i32, i32, i32
  }
  func.func @transform_12(%arg0: i32) -> (i32, i32, i32) {
    %c0_i32 = arith.constant 0 : i32
    %c0_i32_0 = arith.constant 0 : i32
    %c0_i32_1 = arith.constant 0 : i32
    %c0_i32_2 = arith.constant 0 : i32
    return %c0_i32, %c0_i32_0, %c0_i32_1 : i32, i32, i32
  }
  func.func @transform_13(%arg0: i32) -> (i32, i32, i32) {
    %c0_i32 = arith.constant 0 : i32
    %c0_i32_0 = arith.constant 0 : i32
    %c0_i32_1 = arith.constant 0 : i32
    %c0_i32_2 = arith.constant 0 : i32
    return %c0_i32, %c0_i32_0, %c0_i32_1 : i32, i32, i32
  }
  func.func @transform_14(%arg0: i32) -> (i32, i32, i32) {
    %c0_i32 = arith.constant 0 : i32
    %c0_i32_0 = arith.constant 0 : i32
    %c0_i32_1 = arith.constant 0 : i32
    %c0_i32_2 = arith.constant 0 : i32
    return %c0_i32, %c0_i32_0, %c0_i32_1 : i32, i32, i32
  }
  func.func @transform_15(%arg0: i32) -> (i32, i32, i32) {
    %c0_i32 = arith.constant 0 : i32
    %c0_i32_0 = arith.constant 0 : i32
    %c0_i32_1 = arith.constant 0 : i32
    %c0_i32_2 = arith.constant 0 : i32
    return %c0_i32, %c0_i32_0, %c0_i32_1 : i32, i32, i32
  }
  func.func @transform_16(%arg0: i32) -> (i32, i32) {
    %c0_i32 = arith.constant 0 : i32
    %c0_i32_0 = arith.constant 0 : i32
    %c0_i32_1 = arith.constant 0 : i32
    return %c0_i32, %c0_i32_0 : i32, i32
  }
  func.func @transform_17(%arg0: i32) -> (i32, i32) {
    %c0_i32 = arith.constant 0 : i32
    %c0_i32_0 = arith.constant 0 : i32
    %c0_i32_1 = arith.constant 0 : i32
    return %c0_i32, %c0_i32_0 : i32, i32
  }
  func.func @transform_18(%arg0: i32) -> (i32, i32, i32) {
    %c0_i32 = arith.constant 0 : i32
    %c0_i32_0 = arith.constant 0 : i32
    %c0_i32_1 = arith.constant 0 : i32
    return %arg0, %c0_i32, %c0_i32_0 : i32, i32, i32
  }
}

</mosaic_0001>

<bundles_post_ra>
// kernel: bert_class_forward.1
= control target key start
LH: loop header
LB: loop body
LE: loop exit
PB: predicated region body
PF: predicated region fallthrough
CT: control target
= control target key end

     0   :  { %s4117_s27 = smov 0   ;;  %s4697_s0 = inlined_call_operand.vmem [shape: f32[2,8,32], index: 0, kind: input, shape index: {}]   ;;  %s4698_s1 = inlined_call_operand.vmem [shape: f32[2,1,8], index: 1, kind: input, shape index: {}]   ;;  %s4699_s2 = inlined_call_operand.vmem [shape: f32[1,32], index: 2, kind: input, shape index: {}]   ;;  %s4700_s3 = inlined_call_operand.vmem [shape: f32[1,32], index: 3, kind: input, shape index: {}]   ;;  %s4701_s4 = inlined_call_operand.vmem [shape: bf16[2,32,96], index: 4, kind: input, shape index: {}]   ;;  %s4702_s5 = inlined_call_operand.vmem [shape: f32[2,1,96], index: 5, kind: input, shape index: {}]   ;;  %s4703_s6 = inlined_call_operand.vmem [shape: bf16[2,32,32], index: 6, kind: input, shape index: {}]   ;;  %s4704_s7 = inlined_call_operand.vmem [shape: f32[2,1,32], index: 7, kind: input, shape index: {}]   ;;  %s4705_s8 = inlined_call_operand.vmem [shape: f32[2,1,32], index: 8, kind: input, shape index: {}]   ;;  %s4706_s9 = inlined_call_operand.vmem [shape: f32[2,1,32], index: 9, kind: input, shape index: {}]   ;;  %s4707_s10 = inlined_call_operand.vmem [shape: bf16[2,32,64], index: 10, kind: input, shape index: {}]   ;;  %s4708_s11 = inlined_call_operand.vmem [shape: f32[2,1,64], index: 11, kind: input, shape index: {}]   ;;  %s4709_s12 = inlined_call_operand.vmem [shape: bf16[2,64,32], index: 12, kind: input, shape index: {}]   ;;  %s4710_s13 = inlined_call_operand.vmem [shape: f32[2,1,32], index: 13, kind: input, shape index: {}]   ;;  %s4711_s14 = inlined_call_operand.vmem [shape: f32[2,1,32], index: 14, kind: input, shape index: {}]   ;;  %s4712_s15 = inlined_call_operand.vmem [shape: f32[2,1,32], index: 15, kind: input, shape index: {}]   ;;  %s4713_s16 = inlined_call_operand.vmem [shape: f32[32,128], index: 16, kind: input, shape index: {}]   ;;  %s4714_s17 = inlined_call_operand.vmem [shape: f32[1,128], index: 17, kind: input, shape index: {}]   ;;  %s4715_s18 = inlined_call_operand.vmem [shape: f32[2,1,128], index: 18, kind: output, shape index: {}]  }
   0x1   :  { %4718 = sst [smem:[#allocation2_spill]] %s4697_s0 }
   0x2   :  { %4719 = sst [smem:[#allocation3_spill]] %s4698_s1 }
   0x3   :  { %4720 = sst [smem:[#allocation4_spill]] %s4699_s2 }
   0x4 LB: > { %s3548_s28 = sadd.s32 4294967295, %s4007_s27   ;;  %p3552_p0 = scmp.ge.s32.totalorder %s4007_s27, 1  ;;  %s4007_s27 = sphi %s4117_s27, %s28_s27  }
   0x5   : > { %p519_p1 = scmp.lt.s32.totalorder %s4007_s27, 3 }
   0x7   : > { %p520_p2 = pnand %p3552_p0, %p519_p1 }
   0x8   : > { %p573_p3 = scmp.lt.s32.totalorder (!%p520_p2), %s3548_s28, 1  ;;  %vm587_vm0 = vcmask (!%p520_p2), 261120   ;;  %s4721_s19 = sld [smem:[#allocation2_spill]] (!%p520_p2)  ;;  %v3935_v7 = vld [vmem:[%s4701_s4] sm:$0xff] (!%p520_p2)   ;;  %v4009_v8 = vmov (!%p520_p2), 0.0   ;;  %v3936_v9 = vld [vmem:[%s4701_s4 + $0x8] sm:$0xff] (!%p520_p2)   ;;  %v699_v31 = vlaneseq (!%p520_p2) }
   0x9   : > { %523 = sbr.rel (%p520_p2) target bundleno = 6012 (0x177c), region = 92  ;;  %3729 = vmatprep.subr.bf16.mxu1 (!%p520_p2), %v4009_v8  ;;  %3743 = vmatprep.subr.bf16.mxu0 (!%p520_p2), %v4009_v8  ;;  %vm4010_vm1 = vmmov (!%p520_p2), 0   ;;  %s4722_s25 = sld [smem:[#allocation4_spill]] (!%p520_p2)  ;;  %v3555_v16 = vld [vmem:[%s4700_s3] ss:$0 sm:$0xff] (!%p520_p2)  ;;  %vm1134_vm2 = vcmask (!%p520_p2), 64512  }
   0xa   : > { %3730 = vmatpush3.bf16.msra.mxu1 (!%p520_p2), %v3935_v7  ;;  %3733 = vmatprep.mubr.msk.bf16.mxu1 (!%p520_p2), %vm4010_vm1, %v4009_v8  ;;  %v3556_v20 = vld [vmem:[%s4702_s5] ss:$0 sm:$0xff] (!%p520_p2)  ;;  %s4013_s20 = smov (!%p520_p2), 112   ;;  %s4014_s21 = smov (!%p520_p2), 96   ;;  %v4015_v29 = vmov (!%p520_p2), 1983009808  }
   0xb   : > { %3731 = vmatprep.subr.bf16.mxu1 (!%p520_p2), %v4009_v8  ;;  %3745 = vmatprep.mubr.msk.bf16.mxu0 (!%p520_p2), %vm4010_vm1, %v4009_v8  ;;  %v697_v30 = vunpack.c.l.s4 (!%p520_p2), %v4015_v29  ;;  %v700_v33 = vshrl.u32 (!%p520_p2), %v699_v31, 7  ;;  %v4016_v35 = vmov (!%p520_p2), 1934713408   ;;  %s4723_s23 = sld [smem:[#allocation3_spill]] (!%p520_p2)  ;;  %vm1388_vm3 = vcmask (!%p520_p2), 1043456   ;;  %s4018_s22 = smov (!%p520_p2), 16  }
   0xc   : > { %v729_v36 = vunpack.c.l.s4 (!%p520_p2), %v4016_v35  ;;  %s4717_s2 = smov (!%p520_p2), 8   ;;  %vm1719_vm4 = vcmask (!%p520_p2), 130048   ;;  %vm1721_vm5 = vcmask (!%p520_p2), 195584   ;;  %vm1936_vm6 = vcmask (!%p520_p2), 523264  }
   0xd   : > { %v698_v32 = vunpack.c.0.s8 (!%p520_p2), %v697_v30 }
   0xe   : > { %3732 = vmatpush3.bf16.msra.mxu1 (!%p520_p2), %v3936_v9  ;;  %v730_v43 = vunpack.c.0.s8 (!%p520_p2), %v729_v36 }
   0xf   : > { %3737 = vmatprep.subr.bf16.mxu1 (!%p520_p2), %v4009_v8  ;;  %v3554_v14 = vld [vmem:[%s4722_s25] ss:$0 sm:$0xff] (!%p520_p2)  ;;  %v4189_v39 = vsub.s32 (!%p520_p2), %v698_v32, %v700_v33  ;;  %s4017_s25 = smov (!%p520_p2), 64  }
  0x10   : > { %s4727_s28 = smov (!%p573_p3, %s3548_s28), 1  ;;  %v4199_v49 = vsub.s32 %v730_v43, %v700_v33 }
  0x11   : > { %s3553_s29 = sshll.u32 %s4727_s28, 3  ;;  %s579_s24 = scalar_lea.vmem %s4723_s23, %s4727_s28 }
  0x12   : > { %s576_s1 = scalar_lea.vmem %s4721_s19, %s3553_s29  ;;  %s4011_s19 = smov 104  }
  0x13   : > { %v584_v0 = vld [vmem:[%s576_s1] sm:$0xff]  ;;  %s4012_s1 = smov 120   ;;  %s4716_s23 = smov 24  }
  0x14   : > { %v588_v1 = vsel %vm587_vm0, %v584_v0, 0.0 }
  0x15   : > { %589 = vadd.xlane.f32.xlu0 %v588_v1 }
  0xa2   : > { %v590_v2 = vpop.xlane.xlu0 %589 }
  0xa3   : > { %v592_v3 = vmul.f32 0.03125, %v590_v2 }
  0xa5   : > { %v593_v4 = vsub.f32 %v584_v0, %v592_v3 }
  0xa7   : > { %v594_v5 = vmul.f32 %v593_v4, %v593_v4 }
  0xa9   : > { %v595_v6 = vsel %vm587_vm0, %v594_v5, 0.0 }
  0xaa   : > { %596 = vadd.xlane.f32.xlu0 %v595_v6 }
 0x137   : > { %v597_v10 = vpop.xlane.xlu0 %596 }
 0x138   : > { %v598_v11 = vmul.f32 0.03125, %v597_v10 }
 0x13a   : > { %v599_v12 = vadd.f32 1e-12, %v598_v11 }
 0x13c   : > { %3955 = vrsqrt.f32 %v599_v12 }
 0x146   : > { %v3956_v13 = vpop.eup %3955 }
 0x147   : > { %v601_v15 = vmul.f32 %v3956_v13, %v593_v4 }
 0x149   : > { %v608_v17 = vmul.f32 %v3554_v14, %v601_v15 }
 0x14b   : > { %v4153_v18 = vadd.f32 %v3555_v16, %v608_v17 }
 0x14d   : > { %v617_v19 = vpack.c.bf16 %v4153_v18, %v4153_v18 }
 0x14f   : > { %3734 = vmatmul.mubr.msk.bf16.vlgmr.msra.gmra.mrb[0].mxu1 %vm587_vm0, %v617_v19 }
 0x150   : > { %3739 = vmatprep.mubr.msk.bf16.mxu1 %vm4010_vm1, %v4009_v8 }
 0x222   : > { %v678_v21 = vpop.f32.mrb[0].mxu1 }
 0x223   : > { %v4163_v22 = vadd.f32 %v3556_v20, %v678_v21  ;;  %v3735_v23 = vpop.f32.mrb[1].mxu1 }
 0x224   : > { %v681_v24 = vpop.f32.mrb[2].mxu1 }
 0x225   : > { %691 = vrot.lane.b32.xlu0 %v4163_v22, %s4011_s19  ;;  %685 = vrot.lane.b32.xlu1 %v4163_v22, %s4012_s1  ;;  %v3736_v25 = vpop.f32.mrb[3].mxu1 }
 0x229   : > { %688 = vrot.lane.b32.xlu1 %v4163_v22, %s4013_s20 }
 0x22d   : > { %830 = vrot.lane.b32.xlu1 %v4163_v22, %s4014_s21 }
 0x297   : > { %v4173_v26 = vpop.permute.xlu1 %685  ;;  %v4181_v28 = vpop.permute.xlu0 %691 }
 0x298   : > { %832 = vrot.lane.b32.xlu1 %v4173_v26, %s4014_s21  ;;  %v710_v40 = vcombine.low %v4173_v26, %v4181_v28  ;;  %v711_v41 = vcombine.high %v4173_v26, %v4181_v28 }
 0x29a   : > { %v718_v46 = vrot.slane %v710_v40, %v4189_v39  ;;  %v725_v47 = vrot.slane %v711_v41, %v4189_v39 }
 0x29b   : > { %v4177_v27 = vpop.permute.xlu1 %688 }
 0x29c   : > { %834 = vrot.lane.b32.xlu1 %v4177_v27, %s4014_s21  ;;  %v694_v37 = vcombine.low %v4163_v22, %v4177_v27  ;;  %v695_v38 = vcombine.high %v4163_v22, %v4177_v27 }
 0x29e   : > { %v702_v44 = vrot.slane %v694_v37, %v4189_v39  ;;  %v709_v45 = vrot.slane %v695_v38, %v4189_v39 }
 0x29f   : > { %v831_v34 = vpop.permute.xlu1 %830 }
 0x2a0   : > { %836 = vrot.lane.b32.xlu1 %v4181_v28, %s4014_s21  ;;  %v726_v50 = vcombine.low %v702_v44, %v718_v46  ;;  %v727_v51 = vcombine.high %v702_v44, %v718_v46  ;;  %v742_v52 = vcombine.low %v709_v45, %v725_v47  ;;  %v743_v53 = vcombine.high %v709_v45, %v725_v47 }
 0x2a2   : > { %v734_v59 = vrot.slane %v726_v50, %v4199_v49  ;;  %v741_v60 = vrot.slane %v727_v51, %v4199_v49  ;;  %v750_v61 = vrot.slane %v742_v52, %v4199_v49  ;;  %v757_v62 = vrot.slane %v743_v53, %v4199_v49 }
 0x2a4   : > { %v762_v7 = vcombine.low %v734_v59, %v741_v60  ;;  %v3560_v9 = vcombine.high %v734_v59, %v741_v60  ;;  %v778_v10 = vcombine.low %v750_v61, %v757_v62  ;;  %v3561_v11 = vcombine.high %v750_v61, %v757_v62 }
 0x2a6   : > { %v769_v21 = vrot.slane %v762_v7, %v4189_v39  ;;  %v777_v23 = vrot.slane %v3560_v9, %v4189_v39  ;;  %v785_v24 = vrot.slane %v778_v10, %v4189_v39  ;;  %v793_v25 = vrot.slane %v3561_v11, %v4189_v39  ;;  %v4253_v7 = vld [vmem:[%s579_s24] ss:$0 sm:$0xff]  ;;  %s4725_s24 = smov 24  }
 0x2a8   : > { %v794_v40 = vcombine.low %v769_v21, %v777_v23  ;;  %v810_v41 = vcombine.low %v785_v24, %v793_v25 }
 0x2aa   : > { %v818_v50 = vrot.slane %v810_v41, %v4199_v49 }
 0x30a   : > { %v833_v42 = vpop.permute.xlu1 %832 }
 0x30e   : > { %v835_v48 = vpop.permute.xlu1 %834 }
 0x30f   : > { %v842_v54 = vcombine.low %v831_v34, %v835_v48  ;;  %v843_v55 = vcombine.high %v831_v34, %v835_v48  ;;  %v802_v48 = vrot.slane %v794_v40, %v4199_v49 }
 0x311   : > { %v850_v63 = vrot.slane %v842_v54, %v4189_v39  ;;  %v857_v0 = vrot.slane %v843_v55, %v4189_v39  ;;  %v795_v55 = vcombine.high %v769_v21, %v777_v23 }
 0x312   : > { %v837_v56 = vpop.permute.xlu1 %836 }
 0x313   : > { %v858_v57 = vcombine.low %v833_v42, %v837_v56  ;;  %v859_v58 = vcombine.high %v833_v42, %v837_v56  ;;  %v826_v56 = vcombine.low %v802_v48, %v818_v50 }
 0x315   : > { %v866_v1 = vrot.slane %v858_v57, %v4189_v39  ;;  %v873_v2 = vrot.slane %v859_v58, %v4189_v39  ;;  %v827_v57 = vcombine.high %v802_v48, %v818_v50  ;;  %v811_v58 = vcombine.high %v785_v24, %v793_v25 }
 0x316   : > { %v1126_v61 = vpack.c.bf16 %v826_v56, %v826_v56 }
 0x317   : > { %v874_v3 = vcombine.low %v850_v63, %v866_v1  ;;  %v875_v4 = vcombine.high %v850_v63, %v866_v1  ;;  %v890_v5 = vcombine.low %v857_v0, %v873_v2  ;;  %v891_v6 = vcombine.high %v857_v0, %v873_v2 }
 0x318   : > { %v1127_v62 = vpack.c.bf16 %v827_v57, %v827_v57  ;;  %v809_v63 = vrot.slane %v795_v55, %v4199_v49  ;;  %v825_v0 = vrot.slane %v811_v58, %v4199_v49 }
 0x319   : > { %v882_v12 = vrot.slane %v874_v3, %v4199_v49  ;;  %v889_v13 = vrot.slane %v875_v4, %v4199_v49  ;;  %v898_v14 = vrot.slane %v890_v5, %v4199_v49  ;;  %v905_v15 = vrot.slane %v891_v6, %v4199_v49 }
 0x31a   : > { %v828_v3 = vcombine.low %v809_v63, %v825_v0  ;;  %v829_v4 = vcombine.high %v809_v63, %v825_v0 }
 0x31b   : > { %v910_v16 = vcombine.low %v882_v12, %v889_v13  ;;  %v3562_v17 = vcombine.high %v882_v12, %v889_v13  ;;  %v926_v19 = vcombine.low %v898_v14, %v905_v15  ;;  %v3563_v20 = vcombine.high %v898_v14, %v905_v15 }
 0x31c   : > { %v1128_v5 = vpack.c.bf16 %v828_v3, %v828_v3  ;;  %v1129_v6 = vpack.c.bf16 %v829_v4, %v829_v4 }
 0x31d   : > { %v917_v29 = vrot.slane %v910_v16, %v4189_v39  ;;  %v925_v30 = vrot.slane %v3562_v17, %v4189_v39  ;;  %v933_v31 = vrot.slane %v926_v19, %v4189_v39  ;;  %v941_v32 = vrot.slane %v3563_v20, %v4189_v39 }
 0x31f   : > { %v942_v33 = vcombine.low %v917_v29, %v925_v30  ;;  %v958_v34 = vcombine.low %v933_v31, %v941_v32  ;;  %v943_v35 = vcombine.high %v917_v29, %v925_v30  ;;  %v959_v36 = vcombine.high %v933_v31, %v941_v32 }
 0x321   : > { %v950_v37 = vrot.slane %v942_v33, %v4199_v49  ;;  %v966_v38 = vrot.slane %v958_v34, %v4199_v49  ;;  %v957_v44 = vrot.slane %v943_v35, %v4199_v49  ;;  %v973_v45 = vrot.slane %v959_v36, %v4199_v49 }
 0x323   : > { %v974_v42 = vcombine.low %v950_v37, %v966_v38  ;;  %v975_v43 = vcombine.high %v950_v37, %v966_v38  ;;  %v976_v53 = vcombine.low %v957_v44, %v973_v45  ;;  %v977_v54 = vcombine.high %v957_v44, %v973_v45 }
 0x325   : > { %v1130_v46 = vpack.c.bf16 %v974_v42, %v974_v42  ;;  %v1131_v47 = vpack.c.bf16 %v975_v43, %v975_v43  ;;  %v1132_v59 = vpack.c.bf16 %v976_v53, %v976_v53  ;;  %v1133_v60 = vpack.c.bf16 %v977_v54, %v977_v54 }
 0x327   : > { %v1139_v51 = vsel %vm1134_vm2, %v1130_v46, 0  ;;  %v1185_v52 = vsel %vm1134_vm2, %v1131_v47, 0  ;;  %v1231_v1 = vsel %vm1134_vm2, %v1132_v59, 0  ;;  %v1277_v2 = vsel %vm1134_vm2, %v1133_v60, 0 }
 0x328   : > { %3738 = vmatpush3.bf16.xpose.msra.mxu1 %v1139_v51  ;;  %3744 = vmatpush3.bf16.xpose.msra.mxu0 %v1185_v52 }
 0x329   : > { %3749 = vmatprep.subr.bf16.mxu1 %v4009_v8  ;;  %3755 = vmatprep.subr.bf16.mxu0 %v4009_v8 }
 0x32f   : > { %3740 = vmatmul.mubr.msk.bf16.vlgmr.msra.gmra.mrb[4].mxu1 %vm1134_vm2, %v1126_v61  ;;  %3746 = vmatmul.mubr.msk.bf16.vlgmr.msra.gmra.mrb[0].mxu0 %vm1134_vm2, %v1127_v62 }
 0x330   : > { %3750 = vmatpush3.bf16.xpose.msra.mxu1 %v1231_v1  ;;  %3756 = vmatpush3.bf16.xpose.msra.mxu0 %v1277_v2 }
 0x331   : > { %3751 = vmatprep.mubr.msk.bf16.mxu1 %vm4010_vm1, %v4009_v8  ;;  %3757 = vmatprep.mubr.msk.bf16.mxu0 %vm4010_vm1, %v4009_v8 }
 0x332   : > { %3761 = vmatprep.subr.bf16.mxu1 %v4009_v8  ;;  %3767 = vmatprep.subr.bf16.mxu0 %v4009_v8 }
 0x337   : > { %3752 = vmatmul.mubr.msk.bf16.vlgmr.msra.gmra.mrb[8].mxu1 %vm1134_vm2, %v1128_v5  ;;  %3758 = vmatmul.mubr.msk.bf16.vlgmr.msra.gmra.mrb[4].mxu0 %vm1134_vm2, %v1129_v6 }
 0x338   : > { %3763 = vmatprep.mubr.msk.bf16.mxu1 %vm4010_vm1, %v4009_v8  ;;  %3769 = vmatprep.mubr.msk.bf16.mxu0 %vm4010_vm1, %v4009_v8 }
 0x402   : > { %v1175_v9 = vpop.f32.mrb[4].mxu1  ;;  %v1221_v10 = vpop.f32.mrb[0].mxu0 }
 0x403   : > { %v1319_v11 = vmul.f32 0.35355338, %v1175_v9  ;;  %v1320_v12 = vmul.f32 0.35355338, %v1221_v10  ;;  %v3741_v13 = vpop.f32.mrb[5].mxu1  ;;  %v3747_v14 = vpop.f32.mrb[1].mxu0 }
 0x404   : > { %v1178_v15 = vpop.f32.mrb[6].mxu1  ;;  %v1224_v16 = vpop.f32.mrb[2].mxu0 }
 0x405   : > { %v3742_v17 = vpop.f32.mrb[7].mxu1  ;;  %v3748_v19 = vpop.f32.mrb[3].mxu0  ;;  %v1330_v20 = vadd.f32 %v4253_v7, %v1320_v12  ;;  %v1329_v21 = vadd.f32 %v4253_v7, %v1319_v11 }
 0x407   : > { %v1336_v23 = vsel %vm1134_vm2, %v1330_v20, -inf  ;;  %v1333_v24 = vsel %vm1134_vm2, %v1329_v21, -inf }
 0x408   : > { %1337 = vmax.xlane.f32.xlu0 %v1336_v23  ;;  %1334 = vmax.xlane.f32.xlu1 %v1333_v24 }
 0x40a   : > { %v1267_v25 = vpop.f32.mrb[8].mxu1  ;;  %v1313_v29 = vpop.f32.mrb[4].mxu0 }
 0x40b   : > { %v1321_v30 = vmul.f32 0.35355338, %v1267_v25  ;;  %v1322_v31 = vmul.f32 0.35355338, %v1313_v29  ;;  %v3753_v32 = vpop.f32.mrb[9].mxu1  ;;  %v3759_v33 = vpop.f32.mrb[5].mxu0 }
 0x40c   : > { %v1270_v34 = vpop.f32.mrb[10].mxu1  ;;  %v1316_v35 = vpop.f32.mrb[6].mxu0 }
 0x40d   : > { %v3754_v36 = vpop.f32.mrb[11].mxu1  ;;  %v3760_v37 = vpop.f32.mrb[7].mxu0  ;;  %v1332_v38 = vadd.f32 %v4253_v7, %v1322_v31  ;;  %v1331_v40 = vadd.f32 %v4253_v7, %v1321_v30 }
 0x40f   : > { %v1342_v41 = vsel %vm1134_vm2, %v1332_v38, -inf  ;;  %v1339_v42 = vsel %vm1134_vm2, %v1331_v40, -inf }
 0x410   : > { %1343 = vmax.xlane.f32.xlu0 %v1342_v41  ;;  %1340 = vmax.xlane.f32.xlu1 %v1339_v42 }
 0x421   : > { %978 = vrot.lane.b32.xlu1 %v4163_v22, %s4017_s25 }
 0x495   : > { %v1338_v43 = vpop.xlane.xlu0 %1337  ;;  %v1335_v44 = vpop.xlane.xlu1 %1334 }
 0x496   : > { %v1346_v45 = vsub.f32 %v1330_v20, %v1338_v43  ;;  %v1345_v46 = vsub.f32 %v1329_v21, %v1335_v44 }
 0x498   : > { %v1351_v47 = vmul.f32 1.442695, %v1346_v45  ;;  %v1349_v48 = vmul.f32 1.442695, %v1345_v46 }
 0x49a   : > { %3957 = vpow2.f32 %v1351_v47 }
 0x49b   : > { %3959 = vpow2.f32 %v1349_v48 }
 0x49d   : > { %v1341_v22 = vpop.xlane.xlu1 %1340  ;;  %v1344_v55 = vpop.xlane.xlu0 %1343 }
 0x49e   : > { %v1347_v54 = vsub.f32 %v1331_v40, %v1341_v22  ;;  %v1348_v57 = vsub.f32 %v1332_v38, %v1344_v55 }
 0x4a0   : > { %v1353_v56 = vmul.f32 1.442695, %v1347_v54  ;;  %v1355_v58 = vmul.f32 1.442695, %v1348_v57 }
 0x4a2   : > { %3961 = vpow2.f32 %v1353_v56 }
 0x4a3   : > { %3963 = vpow2.f32 %v1355_v58 }
 0x4a4   : > { %v4265_v50 = vpop.eup %3957 }
 0x4a5   : > { %v4267_v51 = vpop.eup %3959  ;;  %v1360_v52 = vsel %vm1134_vm2, %v4265_v50, 0.0 }
 0x4a6   : > { %1361 = vadd.xlane.f32.xlu0 %v1360_v52  ;;  %v1357_v53 = vsel %vm1134_vm2, %v4267_v51, 0.0 }
 0x4a7   : > { %1358 = vadd.xlane.f32.xlu1 %v1357_v53 }
 0x4ac   : > { %v4279_v59 = vpop.eup %3961 }
 0x4ad   : > { %v1363_v60 = vsel %vm1134_vm2, %v4279_v59, 0.0 }
 0x4b8   : > { %982 = vrot.lane.b32.xlu1 %v4177_v27, %s4017_s25  ;;  %v4283_v27 = vpop.eup %3963 }
 0x4bc   : > { %984 = vrot.lane.b32.xlu1 %v4181_v28, %s4017_s25  ;;  %980 = vrot.lane.b32.xlu0 %v4173_v26, %s4017_s25  ;;  %v1366_v28 = vsel %vm1134_vm2, %v4283_v27, 0.0  ;;  %v979_v26 = vpop.permute.xlu1 %978 }
 0x4db   : > { %1364 = vadd.xlane.f32.xlu0 %v1363_v60 }
 0x4e0   : > { %1367 = vadd.xlane.f32.xlu1 %v1366_v28 }
 0x533   : > { %v1362_v62 = vpop.xlane.xlu0 %1361 }
 0x534   : > { %v1359_v61 = vpop.xlane.xlu1 %1358  ;;  %3965 = vrcp.f32 %v1362_v62 }
 0x535   : > { %3967 = vrcp.f32 %v1359_v61 }
 0x537   : > { %v981_v2 = vpop.permute.xlu0 %980 }
 0x538   : > { %v983_v63 = vpop.permute.xlu1 %982 }
 0x539   : > { %v990_v0 = vcombine.low %v979_v26, %v983_v63  ;;  %v991_v1 = vcombine.high %v979_v26, %v983_v63 }
 0x53b   : > { %v998_v6 = vrot.slane %v990_v0, %v4189_v39  ;;  %v1005_v9 = vrot.slane %v991_v1, %v4189_v39 }
 0x53c   : > { %v985_v3 = vpop.permute.xlu1 %984 }
 0x53d   : > { %v1006_v4 = vcombine.low %v981_v2, %v985_v3  ;;  %v1007_v5 = vcombine.high %v981_v2, %v985_v3 }
 0x53e   : > { %v3966_v37 = vpop.eup %3965 }
 0x53f   : > { %v1014_v10 = vrot.slane %v1006_v4, %v4189_v39  ;;  %v1021_v11 = vrot.slane %v1007_v5, %v4189_v39  ;;  %v3968_v43 = vpop.eup %3967  ;;  %v1374_v48 = vmul.f32 %v3966_v37, %v4265_v50 }
 0x540   : > { %v1373_v52 = vmul.f32 %v3968_v43, %v4267_v51 }
 0x541   : > { %v1022_v12 = vcombine.low %v998_v6, %v1014_v10  ;;  %v1023_v13 = vcombine.high %v998_v6, %v1014_v10  ;;  %v1038_v14 = vcombine.low %v1005_v9, %v1021_v11  ;;  %v1039_v15 = vcombine.high %v1005_v9, %v1021_v11 }
 0x542   : > { %v1377_v58 = vpack.c.bf16 %v1373_v52, %v1373_v52  ;;  %v1378_v60 = vpack.c.bf16 %v1374_v48, %v1374_v48 }
 0x543   : > { %v1030_v16 = vrot.slane %v1022_v12, %v4199_v49  ;;  %v1037_v17 = vrot.slane %v1023_v13, %v4199_v49  ;;  %v1046_v19 = vrot.slane %v1038_v14, %v4199_v49  ;;  %v1053_v20 = vrot.slane %v1039_v15, %v4199_v49 }
 0x545   : > { %v1058_v21 = vcombine.low %v1030_v16, %v1037_v17  ;;  %v3564_v23 = vcombine.high %v1030_v16, %v1037_v17  ;;  %v1074_v24 = vcombine.low %v1046_v19, %v1053_v20  ;;  %v3565_v25 = vcombine.high %v1046_v19, %v1053_v20 }
 0x547   : > { %v1065_v29 = vrot.slane %v1058_v21, %v4189_v39  ;;  %v1073_v30 = vrot.slane %v3564_v23, %v4189_v39  ;;  %v1081_v31 = vrot.slane %v1074_v24, %v4189_v39  ;;  %v1089_v32 = vrot.slane %v3565_v25, %v4189_v39 }
 0x549   : > { %v1090_v33 = vcombine.low %v1065_v29, %v1073_v30  ;;  %v1106_v34 = vcombine.low %v1081_v31, %v1089_v32  ;;  %v1091_v35 = vcombine.high %v1065_v29, %v1073_v30  ;;  %v1107_v36 = vcombine.high %v1081_v31, %v1089_v32  ;;  %v3937_v32 = vld [vmem:[%s4703_s6] sm:$0xff]  }
 0x54b   : > { %v1098_v38 = vrot.slane %v1090_v33, %v4199_v49  ;;  %v1114_v40 = vrot.slane %v1106_v34, %v4199_v49  ;;  %v1105_v41 = vrot.slane %v1091_v35, %v4199_v49  ;;  %v1121_v42 = vrot.slane %v1107_v36, %v4199_v49 }
 0x54d   : > { %v1122_v44 = vcombine.low %v1098_v38, %v1114_v40  ;;  %v1123_v45 = vcombine.high %v1098_v38, %v1114_v40  ;;  %v1124_v46 = vcombine.low %v1105_v41, %v1121_v42  ;;  %v1125_v47 = vcombine.high %v1105_v41, %v1121_v42  ;;  %v3938_v42 = vld [vmem:[%s4703_s6 + $0x8] sm:$0xff]  }
 0x54f   : > { %v1381_v53 = vpack.c.bf16 %v1122_v44, %v1122_v44  ;;  %v1382_v22 = vpack.c.bf16 %v1123_v45, %v1123_v45  ;;  %v1383_v56 = vpack.c.bf16 %v1124_v46, %v1124_v46  ;;  %v1384_v57 = vpack.c.bf16 %v1125_v47, %v1125_v47 }
 0x551   : > { %v1390_v54 = vsel %vm1388_vm3, %v1381_v53, 0  ;;  %v1436_v55 = vsel %vm1388_vm3, %v1382_v22, 0  ;;  %v1482_v50 = vsel %vm1388_vm3, %v1383_v56, 0  ;;  %v1528_v51 = vsel %vm1388_vm3, %v1384_v57, 0 }
 0x552   : > { %3762 = vmatpush3.bf16.msra.mxu1 %v1390_v54  ;;  %3768 = vmatpush3.bf16.msra.mxu0 %v1436_v55 }
 0x553   : > { %3773 = vmatprep.subr.bf16.mxu1 %v4009_v8  ;;  %3779 = vmatprep.subr.bf16.mxu0 %v4009_v8 }
 0x555   : > { %3764 = vmatmul.mubr.msk.bf16.vlgmr.msra.gmra.mrb[12].mxu1 %vm1134_vm2, %v1377_v58  ;;  %3770 = vmatmul.mubr.msk.bf16.vlgmr.msra.gmra.mrb[8].mxu0 %vm1134_vm2, %v1378_v60 }
 0x556   : > { %3774 = vmatpush3.bf16.msra.mxu1 %v1482_v50  ;;  %3780 = vmatpush3.bf16.msra.mxu0 %v1528_v51 }
 0x557   : > { %3775 = vmatprep.mubr.msk.bf16.mxu1 %vm4010_vm1, %v4009_v8  ;;  %3781 = vmatprep.mubr.msk.bf16.mxu0 %vm4010_vm1, %v4009_v8 }
 0x558   : > { %3785 = vmatprep.subr.bf16.mxu1 %v4009_v8  ;;  %3793 = vmatprep.subr.bf16.mxu0 %v4009_v8 }
 0x568   : > { %v1365_v28 = vpop.xlane.xlu0 %1364 }
 0x569   : > { %3969 = vrcp.f32 %v1365_v28 }
 0x56d   : > { %v1368_v26 = vpop.xlane.xlu1 %1367 }
 0x56e   : > { %3971 = vrcp.f32 %v1368_v26 }
 0x573   : > { %v3970_v61 = vpop.eup %3969 }
 0x574   : > { %v1375_v62 = vmul.f32 %v3970_v61, %v4279_v59 }
 0x576   : > { %v1379_v63 = vpack.c.bf16 %v1375_v62, %v1375_v62 }
 0x578   : > { %v3972_v0 = vpop.eup %3971  ;;  %3776 = vmatmul.mubr.msk.bf16.vlgmr.msra.gmra.mrb[16].mxu1 %vm1134_vm2, %v1379_v63 }
 0x579   : > { %v1376_v1 = vmul.f32 %v3972_v0, %v4283_v27  ;;  %3789 = vmatprep.mubr.msk.bf16.mxu1 %vm4010_vm1, %v4009_v8  ;;  %3786 = vmatpush3.bf16.msra.mxu1 %v3937_v32 }
 0x57a   : > { %3787 = vmatprep.subr.bf16.mxu1 %v4009_v8 }
 0x57b   : > { %v1380_v2 = vpack.c.bf16 %v1376_v1, %v1376_v1 }
 0x57d   : > { %3782 = vmatmul.mubr.msk.bf16.vlgmr.msra.gmra.mrb[12].mxu0 %vm1134_vm2, %v1380_v2  ;;  %3788 = vmatpush3.bf16.msra.mxu1 %v3938_v42 }
 0x57e   : > { %3797 = vmatprep.mubr.msk.bf16.mxu0 %vm4010_vm1, %v4009_v8  ;;  %3801 = vmatprep.subr.bf16.mxu1 %v4009_v8 }
 0x628   : > { %v1426_v3 = vpop.f32.mrb[12].mxu1  ;;  %v1472_v4 = vpop.f32.mrb[8].mxu0 }
 0x629   : > { %v3765_v5 = vpop.f32.mrb[13].mxu1  ;;  %v3771_v6 = vpop.f32.mrb[9].mxu0 }
 0x62a   : > { %v1429_v59 = vpop.f32.mrb[14].mxu1  ;;  %v1475_v9 = vpop.f32.mrb[10].mxu0  ;;  %v3577_v5 = vld [vmem:[%s4704_s7] ss:$0 sm:$0xff] }
 0x62b   : > { %v3766_v10 = vpop.f32.mrb[15].mxu1  ;;  %v3772_v11 = vpop.f32.mrb[11].mxu0 }
 0x64b   : > { %v1518_v12 = vpop.f32.mrb[16].mxu1 }
 0x64c   : > { %v1570_v13 = vcombine.low %v1426_v3, %v1518_v12  ;;  %v1571_v27 = vcombine.high %v1426_v3, %v1518_v12  ;;  %v3777_v14 = vpop.f32.mrb[17].mxu1 }
 0x64d   : > { %v1521_v15 = vpop.f32.mrb[18].mxu1 }
 0x64e   : > { %v3778_v16 = vpop.f32.mrb[19].mxu1  ;;  %v1578_v24 = vrot.slane %v1570_v13, %v4189_v39  ;;  %v1585_v25 = vrot.slane %v1571_v27, %v4189_v39 }
 0x650   : > { %v1564_v17 = vpop.f32.mrb[12].mxu0 }
 0x651   : > { %v1586_v19 = vcombine.low %v1472_v4, %v1564_v17  ;;  %v1587_v20 = vcombine.high %v1472_v4, %v1564_v17  ;;  %v3783_v21 = vpop.f32.mrb[13].mxu0 }
 0x652   : > { %v1567_v23 = vpop.f32.mrb[14].mxu0 }
 0x653   : > { %v1594_v29 = vrot.slane %v1586_v19, %v4189_v39  ;;  %v1601_v30 = vrot.slane %v1587_v20, %v4189_v39  ;;  %v3784_v31 = vpop.f32.mrb[15].mxu0  ;;  %v3939_v19 = vld [vmem:[%s4707_s10] sm:$0xff]  }
 0x654   : > { %3794 = vmatpush3.bf16.msra.mxu0 %v3939_v19 }
 0x655   : > { %v1602_v33 = vcombine.low %v1578_v24, %v1594_v29  ;;  %v1603_v34 = vcombine.high %v1578_v24, %v1594_v29  ;;  %v1618_v35 = vcombine.low %v1585_v25, %v1601_v30  ;;  %v1619_v36 = vcombine.high %v1585_v25, %v1601_v30  ;;  %3795 = vmatprep.subr.bf16.mxu0 %v4009_v8  ;;  %v3581_v25 = vld [vmem:[%s4705_s8] ss:$0 sm:$0xff] }
 0x656   : > { %v3582_v30 = vld [vmem:[%s4706_s9] ss:$0 sm:$0xff] }
 0x657   : > { %v1610_v37 = vrot.slane %v1602_v33, %v4199_v49  ;;  %v1617_v38 = vrot.slane %v1603_v34, %v4199_v49  ;;  %v1626_v40 = vrot.slane %v1618_v35, %v4199_v49  ;;  %v1633_v41 = vrot.slane %v1619_v36, %v4199_v49  ;;  %v3941_v34 = vld [vmem:[%s4709_s12] sm:$0xff]   ;;  %v3942_v35 = vld [vmem:[%s4709_s12 + $0x8] sm:$0xff]   ;;  %v3943_v36 = vld [vmem:[%s4709_s12 + $0x10] sm:$0xff]  }
 0x659   : > { %v1638_v43 = vcombine.low %v1610_v37, %v1617_v38  ;;  %v3575_v44 = vcombine.high %v1610_v37, %v1617_v38  ;;  %v1654_v45 = vcombine.low %v1626_v40, %v1633_v41  ;;  %v3576_v46 = vcombine.high %v1626_v40, %v1633_v41  ;;  %v3944_v37 = vld [vmem:[%s4709_s12 + $0x18] sm:$0xff]   ;;  %v3583_v38 = vld [vmem:[%s4708_s11] ss:$0 sm:$0xff] }
 0x65b   : > { %v1645_v47 = vrot.slane %v1638_v43, %v4189_v39  ;;  %v1653_v48 = vrot.slane %v3575_v44, %v4189_v39  ;;  %v1661_v52 = vrot.slane %v1654_v45, %v4189_v39  ;;  %v1669_v53 = vrot.slane %v3576_v46, %v4189_v39 }
 0x65d   : > { %v1671_v22 = vcombine.high %v1645_v47, %v1653_v48  ;;  %v1687_v54 = vcombine.high %v1661_v52, %v1669_v53  ;;  %v1670_v55 = vcombine.low %v1645_v47, %v1653_v48  ;;  %v1686_v56 = vcombine.low %v1661_v52, %v1669_v53 }
 0x65f   : > { %v1685_v57 = vrot.slane %v1671_v22, %v4199_v49  ;;  %v1701_v58 = vrot.slane %v1687_v54, %v4199_v49  ;;  %v1678_v60 = vrot.slane %v1670_v55, %v4199_v49  ;;  %v1694_v50 = vrot.slane %v1686_v56, %v4199_v49 }
 0x661   : > { %v1704_v51 = vcombine.low %v1685_v57, %v1701_v58  ;;  %v1703_v28 = vcombine.high %v1678_v60, %v1694_v50  ;;  %v1705_v26 = vcombine.high %v1685_v57, %v1701_v58  ;;  %v1702_v61 = vcombine.low %v1678_v60, %v1694_v50  ;;  %v3587_v57 = vld [vmem:[%s4710_s13] ss:$0 sm:$0xff] }
 0x663   : > { %1711 = vrot.lane.b32.xlu1 %v1704_v51, %s4018_s22  ;;  %1707 = vrot.lane.b32.xlu0 %v1703_v28, %s4717_s2 }
 0x667   : > { %1715 = vrot.lane.b32.xlu0 %v1705_v26, %s4716_s23 }
 0x6d5   : > { %v1708_v62 = vpop.permute.xlu0 %1707  ;;  %v1712_v63 = vpop.permute.xlu1 %1711 }
 0x6d6   : > { %v1718_v0 = vsel %vm1134_vm2, %v1702_v61, %v1708_v62 }
 0x6d7   : > { %v1720_v2 = vsel %vm1719_vm4, %v1718_v0, %v1712_v63 }
 0x6d9   : > { %v1716_v1 = vpop.permute.xlu0 %1715 }
 0x6da   : > { %v1722_v3 = vsel %vm1721_vm5, %v1720_v2, %v1716_v1 }
 0x6db   : > { %v1723_v4 = vpack.c.bf16 %v1722_v3, %v1722_v3  ;;  %v3945_v3 = vld [vmem:[%s4701_s4 + $0x10] sm:$0xff]  }
 0x6dd   : > { %3790 = vmatmul.mubr.msk.bf16.vlgmr.msra.gmra.mrb[20].mxu1 %vm587_vm0, %v1723_v4  ;;  %v3946_v4 = vld [vmem:[%s4701_s4 + $0x18] sm:$0xff]  }
 0x6de   : > { %3809 = vmatprep.mubr.msk.bf16.mxu1 %vm4010_vm1, %v4009_v8  ;;  %3802 = vmatpush3.bf16.msra.mxu1 %v3941_v34 }
 0x6df   : > { %3803 = vmatprep.subr.bf16.mxu1 %v4009_v8 }
 0x6e2   : > { %3804 = vmatpush3.bf16.msra.mxu1 %v3942_v35 }
 0x6e3   : > { %3805 = vmatprep.subr.bf16.mxu1 %v4009_v8 }
 0x6e6   : > { %3806 = vmatpush3.bf16.msra.mxu1 %v3943_v36 }
 0x6e7   : > { %3807 = vmatprep.subr.bf16.mxu1 %v4009_v8 }
 0x6ea   : > { %3808 = vmatpush3.bf16.msra.mxu1 %v3944_v37 }
 0x6eb   : > { %3827 = vmatprep.subr.bf16.mxu1 %v4009_v8 }
 0x7b0   : > { %v1784_v6 = vpop.f32.mrb[20].mxu1 }
 0x7b1   : > { %v1785_v59 = vadd.f32 %v3577_v5, %v1784_v6  ;;  %v3791_v9 = vpop.f32.mrb[21].mxu1 }
 0x7b2   : > { %v1787_v10 = vpop.f32.mrb[22].mxu1 }
 0x7b3   : > { %v3792_v11 = vpop.f32.mrb[23].mxu1  ;;  %v1790_v12 = vadd.f32 %v1785_v59, %v4153_v18  ;;  %v3940_v18 = vld [vmem:[%s4707_s10 + $0x8] sm:$0xff]   ;;  %v3593_v10 = vld [vmem:[%s4711_s14] ss:$0 sm:$0xff] }
 0x7b4   : > { %3796 = vmatpush3.bf16.msra.mxu0 %v3940_v18 }
 0x7b5   : > { %v1793_v13 = vsel %vm587_vm0, %v1790_v12, 0.0  ;;  %3813 = vmatprep.subr.bf16.mxu0 %v4009_v8 }
 0x7b6   : > { %1794 = vadd.xlane.f32.xlu1 %v1793_v13 }
 0x843   : > { %v1795_v27 = vpop.xlane.xlu1 %1794 }
 0x844   : > { %v1796_v14 = vmul.f32 0.03125, %v1795_v27 }
 0x846   : > { %v1797_v15 = vsub.f32 %v1790_v12, %v1796_v14  ;;  %v3594_v12 = vld [vmem:[%s4712_s15] ss:$0 sm:$0xff] }
 0x848   : > { %v1798_v16 = vmul.f32 %v1797_v15, %v1797_v15 }
 0x84a   : > { %v1799_v17 = vsel %vm587_vm0, %v1798_v16, 0.0 }
 0x84b   : > { %1800 = vadd.xlane.f32.xlu0 %v1799_v17 }
 0x8d8   : > { %v1801_v20 = vpop.xlane.xlu0 %1800 }
 0x8d9   : > { %v1802_v21 = vmul.f32 0.03125, %v1801_v20 }
 0x8db   : > { %v1803_v23 = vadd.f32 1e-12, %v1802_v21 }
 0x8dd   : > { %3973 = vrsqrt.f32 %v1803_v23 }
 0x8e7   : > { %v3974_v24 = vpop.eup %3973 }
 0x8e8   : > { %v1805_v29 = vmul.f32 %v3974_v24, %v1797_v15  ;;  %v3600_v15 = vld [vmem:[%s4702_s5 + $0x1] ss:$0 sm:$0xff] }
 0x8ea   : > { %v1812_v31 = vmul.f32 %v3581_v25, %v1805_v29 }
 0x8ec   : > { %v1819_v32 = vadd.f32 %v3582_v30, %v1812_v31 }
 0x8ee   : > { %v1820_v33 = vpack.c.bf16 %v1819_v32, %v1819_v32 }
 0x8f0   : > { %3798 = vmatmul.mubr.msk.bf16.vlgmr.msra.gmra.mrb[16].mxu0 %vm587_vm0, %v1820_v33 }
 0x8f1   : > { %3817 = vmatprep.mubr.msk.bf16.mxu0 %vm4010_vm1, %v4009_v8  ;;  %3814 = vmatpush3.bf16.msra.mxu0 %v3945_v3 }
 0x8f2   : > { %3815 = vmatprep.subr.bf16.mxu0 %v4009_v8 }
 0x8f5   : > { %3816 = vmatpush3.bf16.msra.mxu0 %v3946_v4 }
 0x8f6   : > { %3821 = vmatprep.subr.bf16.mxu0 %v4009_v8 }
 0x9c3   : > { %v1881_v40 = vpop.f32.mrb[16].mxu0 }
 0x9c4   : > { %v1882_v41 = vadd.f32 %v3583_v38, %v1881_v40  ;;  %v3799_v42 = vpop.f32.mrb[17].mxu0 }
 0x9c5   : > { %v1884_v43 = vpop.f32.mrb[18].mxu0 }
 0x9c6   : > { %v1887_v44 = vmul.f32 %v1882_v41, %v1882_v41  ;;  %v3800_v45 = vpop.f32.mrb[19].mxu0 }
 0x9c8   : > { %v1888_v46 = vmul.f32 %v1887_v44, %v1882_v41 }
 0x9ca   : > { %v1889_v47 = vmul.f32 0.044715, %v1888_v46 }
 0x9cc   : > { %v1890_v48 = vadd.f32 %v1889_v47, %v1882_v41 }
 0x9ce   : > { %v1891_v52 = vmul.f32 0.7978846, %v1890_v48 }
 0x9d0   : > { %3975 = vtanh.f32 %v1891_v52 }
 0x9da   : > { %v3976_v53 = vpop.eup %3975 }
 0x9db   : > { %v1893_v22 = vadd.f32 1.0, %v3976_v53 }
 0x9dd   : > { %v1894_v54 = vmul.f32 0.5, %v1893_v22 }
 0x9df   : > { %v1895_v55 = vmul.f32 %v1894_v54, %v1882_v41 }
 0x9e1   : > { %v1896_v56 = vpack.c.bf16 %v1895_v55, %v1895_v55 }
 0x9e3   : > { %3810 = vmatmul.mubr.msk.bf16.vlgmr.msra.gmra.mrb[24].mxu1 %vm1936_vm6, %v1896_v56 }
 0x9e4   : > { %3829 = vmatprep.mubr.msk.bf16.mxu1 %vm4010_vm1, %v4009_v8 }
 0xab6   : > { %v1974_v58 = vpop.f32.mrb[24].mxu1 }
 0xab7   : > { %v1975_v60 = vadd.f32 %v3587_v57, %v1974_v58  ;;  %v3811_v50 = vpop.f32.mrb[25].mxu1 }
 0xab8   : > { %v1977_v51 = vpop.f32.mrb[26].mxu1 }
 0xab9   : > { %v3812_v28 = vpop.f32.mrb[27].mxu1  ;;  %v1980_v26 = vadd.f32 %v1975_v60, %v1819_v32 }
 0xabb   : > { %v1983_v61 = vsel %vm587_vm0, %v1980_v26, 0.0 }
 0xabc   : > { %1984 = vadd.xlane.f32.xlu0 %v1983_v61 }
 0xb49   : > { %v1985_v62 = vpop.xlane.xlu0 %1984 }
 0xb4a   : > { %v1986_v63 = vmul.f32 0.03125, %v1985_v62 }
 0xb4c   : > { %v1987_v0 = vsub.f32 %v1980_v26, %v1986_v63 }
 0xb4e   : > { %v1988_v1 = vmul.f32 %v1987_v0, %v1987_v0 }
 0xb50   : > { %v1989_v2 = vsel %vm587_vm0, %v1988_v1, 0.0 }
 0xb51   : > { %1990 = vadd.xlane.f32.xlu1 %v1989_v2 }
 0xbde   : > { %v1991_v5 = vpop.xlane.xlu1 %1990 }
 0xbdf   : > { %v1992_v6 = vmul.f32 0.03125, %v1991_v5 }
 0xbe1   : > { %v1993_v59 = vadd.f32 1e-12, %v1992_v6 }
 0xbe3   : > { %3977 = vrsqrt.f32 %v1993_v59 }
 0xbed   : > { %v3978_v9 = vpop.eup %3977 }
 0xbee   : > { %v1995_v11 = vmul.f32 %v3978_v9, %v1987_v0 }
 0xbf0   : > { %v2002_v13 = vmul.f32 %v3593_v10, %v1995_v11 }
 0xbf2   : > { %v4424_v27 = vadd.f32 %v3594_v12, %v2002_v13 }
 0xbf4   : > { %v2010_v14 = vpack.c.bf16 %v4424_v27, %v4424_v27 }
 0xbf6   : > { %3818 = vmatmul.mubr.msk.bf16.vlgmr.msra.gmra.mrb[20].mxu0 %vm587_vm0, %v2010_v14 }
 0xbf7   : > { %3823 = vmatprep.mubr.msk.bf16.mxu0 %vm4010_vm1, %v4009_v8 }
 0xcc9   : > { %v2073_v16 = vpop.f32.mrb[20].mxu0 }
 0xcca   : > { %v4434_v17 = vadd.f32 %v3600_v15, %v2073_v16  ;;  %v3819_v19 = vpop.f32.mrb[21].mxu0 }
 0xccb   : > { %v2076_v18 = vpop.f32.mrb[22].mxu0 }
 0xccc   : > { %2083 = vrot.lane.b32.xlu1 %v4434_v17, %s4013_s20  ;;  %2080 = vrot.lane.b32.xlu0 %v4434_v17, %s4012_s1  ;;  %v3820_v20 = vpop.f32.mrb[23].mxu0 }
 0xcd0   : > { %2086 = vrot.lane.b32.xlu1 %v4434_v17, %s4011_s19  ;;  %2225 = vrot.lane.b32.xlu0 %v4434_v17, %s4014_s21 }
 0xd3e   : > { %v4444_v21 = vpop.permute.xlu1 %2083  ;;  %v4446_v23 = vpop.permute.xlu0 %2080 }
 0xd3f   : > { %2229 = vrot.lane.b32.xlu0 %v4444_v21, %s4014_s21  ;;  %2227 = vrot.lane.b32.xlu1 %v4446_v23, %s4014_s21  ;;  %v2089_v30 = vcombine.low %v4434_v17, %v4444_v21  ;;  %v2090_v31 = vcombine.high %v4434_v17, %v4444_v21 }
 0xd41   : > { %v2097_v35 = vrot.slane %v2089_v30, %v4189_v39  ;;  %v2104_v36 = vrot.slane %v2090_v31, %v4189_v39 }
 0xd42   : > { %v4452_v24 = vpop.permute.xlu1 %2086  ;;  %v2226_v32 = vpop.permute.xlu0 %2225 }
 0xd43   : > { %2231 = vrot.lane.b32.xlu1 %v4452_v24, %s4014_s21  ;;  %v2105_v25 = vcombine.low %v4446_v23, %v4452_v24  ;;  %v2106_v29 = vcombine.high %v4446_v23, %v4452_v24 }
 0xd45   : > { %v2113_v33 = vrot.slane %v2105_v25, %v4189_v39  ;;  %v2120_v34 = vrot.slane %v2106_v29, %v4189_v39 }
 0xd47   : > { %v2121_v40 = vcombine.low %v2097_v35, %v2113_v33  ;;  %v2122_v41 = vcombine.high %v2097_v35, %v2113_v33  ;;  %v2137_v42 = vcombine.low %v2104_v36, %v2120_v34  ;;  %v2138_v43 = vcombine.high %v2104_v36, %v2120_v34 }
 0xd49   : > { %v2129_v52 = vrot.slane %v2121_v40, %v4199_v49  ;;  %v2136_v53 = vrot.slane %v2122_v41, %v4199_v49  ;;  %v2145_v22 = vrot.slane %v2137_v42, %v4199_v49  ;;  %v2152_v54 = vrot.slane %v2138_v43, %v4199_v49 }
 0xd4b   : > { %v2157_v26 = vcombine.low %v2129_v52, %v2136_v53  ;;  %v3604_v61 = vcombine.high %v2129_v52, %v2136_v53  ;;  %v2173_v62 = vcombine.low %v2145_v22, %v2152_v54  ;;  %v3605_v63 = vcombine.high %v2145_v22, %v2152_v54 }
 0xd4d   : > { %v2164_v9 = vrot.slane %v2157_v26, %v4189_v39  ;;  %v2172_v10 = vrot.slane %v3604_v61, %v4189_v39  ;;  %v2180_v11 = vrot.slane %v2173_v62, %v4189_v39  ;;  %v2188_v12 = vrot.slane %v3605_v63, %v4189_v39 }
 0xd4f   : > { %v2189_v31 = vcombine.low %v2164_v9, %v2172_v10  ;;  %v2206_v52 = vcombine.high %v2180_v11, %v2188_v12 }
 0xd51   : > { %v2197_v40 = vrot.slane %v2189_v31, %v4199_v49 }
 0xdb1   : > { %v2228_v37 = vpop.permute.xlu1 %2227  ;;  %v2230_v38 = vpop.permute.xlu0 %2229 }
 0xdb2   : > { %v2237_v44 = vcombine.low %v2226_v32, %v2230_v38  ;;  %v2238_v45 = vcombine.high %v2226_v32, %v2230_v38  ;;  %v2205_v32 = vcombine.low %v2180_v11, %v2188_v12 }
 0xdb4   : > { %v2245_v55 = vrot.slane %v2237_v44, %v4189_v39  ;;  %v2252_v56 = vrot.slane %v2238_v45, %v4189_v39  ;;  %v2213_v41 = vrot.slane %v2205_v32, %v4199_v49 }
 0xdb5   : > { %v2232_v46 = vpop.permute.xlu1 %2231 }
 0xdb6   : > { %v2253_v47 = vcombine.low %v2228_v37, %v2232_v46  ;;  %v2254_v48 = vcombine.high %v2228_v37, %v2232_v46  ;;  %v2190_v46 = vcombine.high %v2164_v9, %v2172_v10 }
 0xdb8   : > { %v2261_v57 = vrot.slane %v2253_v47, %v4189_v39  ;;  %v2268_v58 = vrot.slane %v2254_v48, %v4189_v39  ;;  %v2221_v47 = vcombine.low %v2197_v40, %v2213_v41  ;;  %v2222_v48 = vcombine.high %v2197_v40, %v2213_v41 }
 0xdba   : > { %v2269_v60 = vcombine.low %v2245_v55, %v2261_v57  ;;  %v2270_v50 = vcombine.high %v2245_v55, %v2261_v57  ;;  %v2285_v51 = vcombine.low %v2252_v56, %v2268_v58  ;;  %v2286_v28 = vcombine.high %v2252_v56, %v2268_v58 }
 0xdbb   : > { %v2521_v54 = vpack.c.bf16 %v2221_v47, %v2221_v47  ;;  %v2522_v55 = vpack.c.bf16 %v2222_v48, %v2222_v48  ;;  %v2204_v56 = vrot.slane %v2190_v46, %v4199_v49  ;;  %v2220_v57 = vrot.slane %v2206_v52, %v4199_v49 }
 0xdbc   : > { %v2277_v0 = vrot.slane %v2269_v60, %v4199_v49  ;;  %v2284_v1 = vrot.slane %v2270_v50, %v4199_v49  ;;  %v2293_v2 = vrot.slane %v2285_v51, %v4199_v49  ;;  %v2300_v3 = vrot.slane %v2286_v28, %v4199_v49 }
 0xdbd   : > { %v2223_v50 = vcombine.low %v2204_v56, %v2220_v57  ;;  %v2224_v51 = vcombine.high %v2204_v56, %v2220_v57 }
 0xdbe   : > { %v2305_v4 = vcombine.low %v2277_v0, %v2284_v1  ;;  %v3606_v5 = vcombine.high %v2277_v0, %v2284_v1  ;;  %v2321_v6 = vcombine.low %v2293_v2, %v2300_v3  ;;  %v3607_v59 = vcombine.high %v2293_v2, %v2300_v3 }
 0xdbf   : > { %v2523_v28 = vpack.c.bf16 %v2223_v50, %v2223_v50  ;;  %v2524_v26 = vpack.c.bf16 %v2224_v51, %v2224_v51 }
 0xdc0   : > { %v2312_v13 = vrot.slane %v2305_v4, %v4189_v39  ;;  %v2320_v14 = vrot.slane %v3606_v5, %v4189_v39  ;;  %v2328_v15 = vrot.slane %v2321_v6, %v4189_v39  ;;  %v2336_v16 = vrot.slane %v3607_v59, %v4189_v39 }
 0xdc2   : > { %v2337_v19 = vcombine.low %v2312_v13, %v2320_v14  ;;  %v2353_v18 = vcombine.low %v2328_v15, %v2336_v16  ;;  %v2338_v20 = vcombine.high %v2312_v13, %v2320_v14  ;;  %v2354_v25 = vcombine.high %v2328_v15, %v2336_v16 }
 0xdc4   : > { %v2345_v29 = vrot.slane %v2337_v19, %v4199_v49  ;;  %v2361_v30 = vrot.slane %v2353_v18, %v4199_v49  ;;  %v2352_v35 = vrot.slane %v2338_v20, %v4199_v49  ;;  %v2368_v36 = vrot.slane %v2354_v25, %v4199_v49 }
 0xdc6   : > { %v2369_v33 = vcombine.low %v2345_v29, %v2361_v30  ;;  %v2370_v34 = vcombine.high %v2345_v29, %v2361_v30  ;;  %v2371_v44 = vcombine.low %v2352_v35, %v2368_v36  ;;  %v2372_v45 = vcombine.high %v2352_v35, %v2368_v36 }
 0xdc8   : > { %v2525_v37 = vpack.c.bf16 %v2369_v33, %v2369_v33  ;;  %v2526_v38 = vpack.c.bf16 %v2370_v34, %v2370_v34  ;;  %v2527_v53 = vpack.c.bf16 %v2371_v44, %v2371_v44  ;;  %v2528_v22 = vpack.c.bf16 %v2372_v45, %v2372_v45 }
 0xdca   : > { %v2533_v42 = vsel %vm1134_vm2, %v2525_v37, 0  ;;  %v2579_v43 = vsel %vm1134_vm2, %v2526_v38, 0  ;;  %v2625_v58 = vsel %vm1134_vm2, %v2527_v53, 0  ;;  %v2671_v60 = vsel %vm1134_vm2, %v2528_v22, 0 }
 0xdcb   : > { %3822 = vmatpush3.bf16.xpose.msra.mxu0 %v2533_v42  ;;  %3828 = vmatpush3.bf16.xpose.msra.mxu1 %v2579_v43 }
 0xdcc   : > { %3833 = vmatprep.subr.bf16.mxu0 %v4009_v8  ;;  %3839 = vmatprep.subr.bf16.mxu1 %v4009_v8 }
 0xdd2   : > { %3824 = vmatmul.mubr.msk.bf16.vlgmr.msra.gmra.mrb[24].mxu0 %vm1134_vm2, %v2521_v54  ;;  %3830 = vmatmul.mubr.msk.bf16.vlgmr.msra.gmra.mrb[28].mxu1 %vm1134_vm2, %v2522_v55 }
 0xdd3   : > { %3834 = vmatpush3.bf16.xpose.msra.mxu0 %v2625_v58  ;;  %3840 = vmatpush3.bf16.xpose.msra.mxu1 %v2671_v60 }
 0xdd4   : > { %3835 = vmatprep.mubr.msk.bf16.mxu0 %vm4010_vm1, %v4009_v8  ;;  %3841 = vmatprep.mubr.msk.bf16.mxu1 %vm4010_vm1, %v4009_v8 }
 0xdd5   : > { %3845 = vmatprep.subr.bf16.mxu0 %v4009_v8  ;;  %3851 = vmatprep.subr.bf16.mxu1 %v4009_v8 }
 0xdda   : > { %3836 = vmatmul.mubr.msk.bf16.vlgmr.msra.gmra.mrb[28].mxu0 %vm1134_vm2, %v2523_v28  ;;  %3842 = vmatmul.mubr.msk.bf16.vlgmr.msra.gmra.mrb[32].mxu1 %vm1134_vm2, %v2524_v26 }
 0xddb   : > { %3847 = vmatprep.mubr.msk.bf16.mxu0 %vm4010_vm1, %v4009_v8  ;;  %3853 = vmatprep.mubr.msk.bf16.mxu1 %vm4010_vm1, %v4009_v8 }
 0xea5   : > { %v2569_v61 = vpop.f32.mrb[24].mxu0  ;;  %v2615_v62 = vpop.f32.mrb[28].mxu1 }
 0xea6   : > { %v2713_v63 = vmul.f32 0.35355338, %v2569_v61  ;;  %v2714_v0 = vmul.f32 0.35355338, %v2615_v62  ;;  %v3825_v1 = vpop.f32.mrb[25].mxu0  ;;  %v3831_v2 = vpop.f32.mrb[29].mxu1 }
 0xea7   : > { %v2572_v3 = vpop.f32.mrb[26].mxu0  ;;  %v2618_v4 = vpop.f32.mrb[30].mxu1 }
 0xea8   : > { %v3826_v5 = vpop.f32.mrb[27].mxu0  ;;  %v3832_v6 = vpop.f32.mrb[31].mxu1  ;;  %v2717_v59 = vadd.f32 %v4253_v7, %v2713_v63  ;;  %v2718_v9 = vadd.f32 %v4253_v7, %v2714_v0 }
 0xeaa   : > { %v2721_v10 = vsel %vm1134_vm2, %v2717_v59, -inf  ;;  %v2724_v11 = vsel %vm1134_vm2, %v2718_v9, -inf }
 0xeab   : > { %2722 = vmax.xlane.f32.xlu0 %v2721_v10  ;;  %2725 = vmax.xlane.f32.xlu1 %v2724_v11 }
 0xead   : > { %v2661_v12 = vpop.f32.mrb[28].mxu0  ;;  %v2707_v13 = vpop.f32.mrb[32].mxu1 }
 0xeae   : > { %v2715_v14 = vmul.f32 0.35355338, %v2661_v12  ;;  %v2716_v15 = vmul.f32 0.35355338, %v2707_v13  ;;  %v3837_v16 = vpop.f32.mrb[29].mxu0  ;;  %v3843_v19 = vpop.f32.mrb[33].mxu1 }
 0xeaf   : > { %v2664_v18 = vpop.f32.mrb[30].mxu0  ;;  %v2710_v20 = vpop.f32.mrb[34].mxu1 }
 0xeb0   : > { %v3838_v25 = vpop.f32.mrb[31].mxu0  ;;  %v3844_v29 = vpop.f32.mrb[35].mxu1  ;;  %v2719_v30 = vadd.f32 %v4253_v7, %v2715_v14  ;;  %v2720_v32 = vadd.f32 %v4253_v7, %v2716_v15 }
 0xeb2   : > { %v2727_v31 = vsel %vm1134_vm2, %v2719_v30, -inf  ;;  %v2730_v33 = vsel %vm1134_vm2, %v2720_v32, -inf }
 0xeb3   : > { %2728 = vmax.xlane.f32.xlu0 %v2727_v31 }
 0xeb7   : > { %2731 = vmax.xlane.f32.xlu0 %v2730_v33 }
 0xebc   : > { %2373 = vrot.lane.b32.xlu1 %v4434_v17, %s4017_s25 }
 0xf38   : > { %v2723_v34 = vpop.xlane.xlu0 %2722  ;;  %v2726_v35 = vpop.xlane.xlu1 %2725 }
 0xf39   : > { %v2733_v36 = vsub.f32 %v2717_v59, %v2723_v34  ;;  %v2734_v37 = vsub.f32 %v2718_v9, %v2726_v35 }
 0xf3b   : > { %v2737_v38 = vmul.f32 1.442695, %v2733_v36  ;;  %v2739_v40 = vmul.f32 1.442695, %v2734_v37 }
 0xf3d   : > { %3979 = vpow2.f32 %v2737_v38 }
 0xf3e   : > { %3981 = vpow2.f32 %v2739_v40 }
 0xf40   : > { %v2729_v17 = vpop.xlane.xlu0 %2728 }
 0xf41   : > { %v2735_v44 = vsub.f32 %v2719_v30, %v2729_v17 }
 0xf43   : > { %v2741_v47 = vmul.f32 1.442695, %v2735_v44 }
 0xf44   : > { %v2732_v45 = vpop.xlane.xlu0 %2731 }
 0xf45   : > { %v2736_v46 = vsub.f32 %v2720_v32, %v2732_v45  ;;  %3983 = vpow2.f32 %v2741_v47 }
 0xf47   : > { %v4526_v41 = vpop.eup %3979  ;;  %v2743_v48 = vmul.f32 1.442695, %v2736_v46 }
 0xf48   : > { %v4528_v42 = vpop.eup %3981  ;;  %v2745_v7 = vsel %vm1134_vm2, %v4526_v41, 0.0 }
 0xf49   : > { %2746 = vadd.xlane.f32.xlu1 %v2745_v7  ;;  %v2748_v43 = vsel %vm1134_vm2, %v4528_v42, 0.0  ;;  %3985 = vpow2.f32 %v2743_v48 }
 0xf4a   : > { %2749 = vadd.xlane.f32.xlu0 %v2748_v43 }
 0xf4f   : > { %v4540_v52 = vpop.eup %3983 }
 0xf53   : > { %v4542_v53 = vpop.eup %3985 }
 0xf5a   : > { %2377 = vrot.lane.b32.xlu1 %v4444_v21, %s4017_s25  ;;  %v2751_v21 = vsel %vm1134_vm2, %v4540_v52, 0.0 }
 0xf5e   : > { %2379 = vrot.lane.b32.xlu1 %v4452_v24, %s4017_s25  ;;  %v2754_v24 = vsel %vm1134_vm2, %v4542_v53, 0.0 }
 0xf60   : > { %2375 = vrot.lane.b32.xlu0 %v4446_v23, %s4017_s25  ;;  %v2374_v23 = vpop.permute.xlu1 %2373  ;;  %s4724_s25 = smov 8  }
 0xf7f   : > { %2752 = vadd.xlane.f32.xlu0 %v2751_v21 }
 0xf82   : > { %2755 = vadd.xlane.f32.xlu1 %v2754_v24 }
 0xfd6   : > { %v2747_v22 = vpop.xlane.xlu1 %2746 }
 0xfd7   : > { %v2750_v54 = vpop.xlane.xlu0 %2749  ;;  %3987 = vrcp.f32 %v2747_v22 }
 0xfd8   : > { %3989 = vrcp.f32 %v2750_v54 }
 0xfda   : > { %v2378_v55 = vpop.permute.xlu1 %2377 }
 0xfdb   : > { %v2385_v56 = vcombine.low %v2374_v23, %v2378_v55  ;;  %v2386_v57 = vcombine.high %v2374_v23, %v2378_v55  ;;  %v2376_v58 = vpop.permute.xlu0 %2375 }
 0xfdd   : > { %v2393_v28 = vrot.slane %v2385_v56, %v4189_v39  ;;  %v2400_v26 = vrot.slane %v2386_v57, %v4189_v39 }
 0xfde   : > { %v2380_v60 = vpop.permute.xlu1 %2379 }
 0xfdf   : > { %v2401_v50 = vcombine.low %v2376_v58, %v2380_v60  ;;  %v2402_v51 = vcombine.high %v2376_v58, %v2380_v60 }
 0xfe1   : > { %v2409_v61 = vrot.slane %v2401_v50, %v4189_v39  ;;  %v2416_v62 = vrot.slane %v2402_v51, %v4189_v39  ;;  %v3988_v30 = vpop.eup %3987 }
 0xfe2   : > { %v3990_v33 = vpop.eup %3989  ;;  %v2761_v38 = vmul.f32 %v3988_v30, %v4526_v41 }
 0xfe3   : > { %v2417_v63 = vcombine.low %v2393_v28, %v2409_v61  ;;  %v2418_v0 = vcombine.high %v2393_v28, %v2409_v61  ;;  %v2433_v1 = vcombine.low %v2400_v26, %v2416_v62  ;;  %v2434_v2 = vcombine.high %v2400_v26, %v2416_v62 }
 0xfe4   : > { %v2762_v40 = vmul.f32 %v3990_v33, %v4528_v42  ;;  %v2765_v47 = vpack.c.bf16 %v2761_v38, %v2761_v38 }
 0xfe5   : > { %v2425_v3 = vrot.slane %v2417_v63, %v4199_v49  ;;  %v2432_v4 = vrot.slane %v2418_v0, %v4199_v49  ;;  %v2441_v5 = vrot.slane %v2433_v1, %v4199_v49  ;;  %v2448_v6 = vrot.slane %v2434_v2, %v4199_v49 }
 0xfe6   : > { %v2766_v48 = vpack.c.bf16 %v2762_v40, %v2762_v40 }
 0xfe7   : > { %v2453_v59 = vcombine.low %v2425_v3, %v2432_v4  ;;  %v3608_v9 = vcombine.high %v2425_v3, %v2432_v4  ;;  %v2469_v10 = vcombine.low %v2441_v5, %v2448_v6  ;;  %v3609_v11 = vcombine.high %v2441_v5, %v2448_v6 }
 0xfe9   : > { %v2460_v12 = vrot.slane %v2453_v59, %v4189_v39  ;;  %v2468_v13 = vrot.slane %v3608_v9, %v4189_v39  ;;  %v2476_v14 = vrot.slane %v2469_v10, %v4189_v39  ;;  %v2484_v15 = vrot.slane %v3609_v11, %v4189_v39 }
 0xfeb   : > { %v2485_v16 = vcombine.low %v2460_v12, %v2468_v13  ;;  %v2486_v19 = vcombine.high %v2460_v12, %v2468_v13  ;;  %v2501_v18 = vcombine.low %v2476_v14, %v2484_v15  ;;  %v2502_v20 = vcombine.high %v2476_v14, %v2484_v15 }
 0xfed   : > { %v2493_v25 = vrot.slane %v2485_v16, %v4199_v49  ;;  %v2500_v29 = vrot.slane %v2486_v19, %v4199_v49  ;;  %v2509_v31 = vrot.slane %v2501_v18, %v4199_v49  ;;  %v2516_v32 = vrot.slane %v2502_v20, %v4199_v49  ;;  %v3947_v18 = vld [vmem:[%s4703_s6 + $0x10] sm:$0xff]  }
 0xfef   : > { %v2517_v34 = vcombine.low %v2493_v25, %v2509_v31  ;;  %v2518_v35 = vcombine.high %v2493_v25, %v2509_v31  ;;  %v2519_v36 = vcombine.low %v2500_v29, %v2516_v32  ;;  %v2520_v37 = vcombine.high %v2500_v29, %v2516_v32 }
 0xff1   : > { %v2769_v7 = vpack.c.bf16 %v2517_v34, %v2517_v34  ;;  %v2770_v43 = vpack.c.bf16 %v2518_v35, %v2518_v35  ;;  %v2771_v45 = vpack.c.bf16 %v2519_v36, %v2519_v36  ;;  %v2772_v46 = vpack.c.bf16 %v2520_v37, %v2520_v37  ;;  %v3948_v35 = vld [vmem:[%s4703_s6 + $0x18] sm:$0xff]  }
 0xff3   : > { %v2777_v17 = vsel %vm1388_vm3, %v2769_v7, 0  ;;  %v2823_v44 = vsel %vm1388_vm3, %v2770_v43, 0  ;;  %v2869_v41 = vsel %vm1388_vm3, %v2771_v45, 0  ;;  %v2915_v42 = vsel %vm1388_vm3, %v2772_v46, 0 }
 0xff4   : > { %3846 = vmatpush3.bf16.msra.mxu0 %v2777_v17  ;;  %3852 = vmatpush3.bf16.msra.mxu1 %v2823_v44 }
 0xff5   : > { %3857 = vmatprep.subr.bf16.mxu0 %v4009_v8  ;;  %3863 = vmatprep.subr.bf16.mxu1 %v4009_v8 }
 0xff7   : > { %3848 = vmatmul.mubr.msk.bf16.vlgmr.msra.gmra.mrb[32].mxu0 %vm1134_vm2, %v2765_v47  ;;  %3854 = vmatmul.mubr.msk.bf16.vlgmr.msra.gmra.mrb[36].mxu1 %vm1134_vm2, %v2766_v48 }
 0xff8   : > { %3858 = vmatpush3.bf16.msra.mxu0 %v2869_v41  ;;  %3864 = vmatpush3.bf16.msra.mxu1 %v2915_v42 }
 0xff9   : > { %3859 = vmatprep.mubr.msk.bf16.mxu0 %vm4010_vm1, %v4009_v8  ;;  %3865 = vmatprep.mubr.msk.bf16.mxu1 %vm4010_vm1, %v4009_v8 }
 0xffa   : > { %3869 = vmatprep.subr.bf16.mxu0 %v4009_v8  ;;  %3877 = vmatprep.subr.bf16.mxu1 %v4009_v8 }
0x100c   : > { %v2753_v21 = vpop.xlane.xlu0 %2752 }
0x100d   : > { %3991 = vrcp.f32 %v2753_v21 }
0x100f   : > { %v2756_v24 = vpop.xlane.xlu1 %2755 }
0x1010   : > { %3993 = vrcp.f32 %v2756_v24 }
0x1017   : > { %v3992_v23 = vpop.eup %3991 }
0x1018   : > { %v2763_v22 = vmul.f32 %v3992_v23, %v4540_v52 }
0x101a   : > { %v3994_v54 = vpop.eup %3993  ;;  %v2767_v55 = vpack.c.bf16 %v2763_v22, %v2763_v22 }
0x101b   : > { %v2764_v56 = vmul.f32 %v3994_v54, %v4542_v53 }
0x101c   : > { %3860 = vmatmul.mubr.msk.bf16.vlgmr.msra.gmra.mrb[36].mxu0 %vm1134_vm2, %v2767_v55 }
0x101d   : > { %v2768_v57 = vpack.c.bf16 %v2764_v56, %v2764_v56  ;;  %3873 = vmatprep.mubr.msk.bf16.mxu0 %vm4010_vm1, %v4009_v8  ;;  %3870 = vmatpush3.bf16.msra.mxu0 %v3947_v18 }
0x101e   : > { %3871 = vmatprep.subr.bf16.mxu0 %v4009_v8 }
0x101f   : > { %3866 = vmatmul.mubr.msk.bf16.vlgmr.msra.gmra.mrb[40].mxu1 %vm1134_vm2, %v2768_v57  ;;  %v3625_v57 = vld [vmem:[%s4704_s7 + $0x1] ss:$0 sm:$0xff] }
0x1020   : > { %3881 = vmatprep.mubr.msk.bf16.mxu1 %vm4010_vm1, %v4009_v8 }
0x1021   : > { %3872 = vmatpush3.bf16.msra.mxu0 %v3948_v35 }
0x1022   : > { %3885 = vmatprep.subr.bf16.mxu0 %v4009_v8 }
0x10ca   : > { %v2813_v58 = vpop.f32.mrb[32].mxu0  ;;  %v2859_v60 = vpop.f32.mrb[36].mxu1 }
0x10cb   : > { %v3849_v50 = vpop.f32.mrb[33].mxu0  ;;  %v3855_v51 = vpop.f32.mrb[37].mxu1 }
0x10cc   : > { %v2816_v52 = vpop.f32.mrb[34].mxu0  ;;  %v2862_v28 = vpop.f32.mrb[38].mxu1 }
0x10cd   : > { %v3850_v26 = vpop.f32.mrb[35].mxu0  ;;  %v3856_v61 = vpop.f32.mrb[39].mxu1 }
0x10ef   : > { %v2905_v53 = vpop.f32.mrb[36].mxu0 }
0x10f0   : > { %v2957_v62 = vcombine.low %v2813_v58, %v2905_v53  ;;  %v2958_v63 = vcombine.high %v2813_v58, %v2905_v53  ;;  %v3861_v0 = vpop.f32.mrb[37].mxu0 }
0x10f1   : > { %v2908_v1 = vpop.f32.mrb[38].mxu0 }
0x10f2   : > { %v3862_v2 = vpop.f32.mrb[39].mxu0  ;;  %v2951_v3 = vpop.f32.mrb[40].mxu1  ;;  %v2965_v9 = vrot.slane %v2957_v62, %v4189_v39  ;;  %v2972_v10 = vrot.slane %v2958_v63, %v4189_v39  ;;  %v3949_v1 = vld [vmem:[%s4707_s10 + $0x10] sm:$0xff]  }
0x10f3   : > { %v2973_v4 = vcombine.low %v2859_v60, %v2951_v3  ;;  %v2974_v5 = vcombine.high %v2859_v60, %v2951_v3  ;;  %v3867_v6 = vpop.f32.mrb[41].mxu1  ;;  %3878 = vmatpush3.bf16.msra.mxu1 %v3949_v1  ;;  %v3950_v2 = vld [vmem:[%s4707_s10 + $0x18] sm:$0xff]  }
0x10f4   : > { %v2954_v59 = vpop.f32.mrb[42].mxu1  ;;  %3879 = vmatprep.subr.bf16.mxu1 %v4009_v8  ;;  %v3631_v6 = vld [vmem:[%s4705_s8 + $0x1] ss:$0 sm:$0xff] }
0x10f5   : > { %v2981_v11 = vrot.slane %v2973_v4, %v4189_v39  ;;  %v2988_v12 = vrot.slane %v2974_v5, %v4189_v39  ;;  %v3868_v13 = vpop.f32.mrb[43].mxu1 }
0x10f6   : > { %v3951_v13 = vld [vmem:[%s4709_s12 + $0x20] sm:$0xff]  }
0x10f7   : > { %v2989_v14 = vcombine.low %v2965_v9, %v2981_v11  ;;  %v2990_v15 = vcombine.high %v2965_v9, %v2981_v11  ;;  %v3005_v16 = vcombine.low %v2972_v10, %v2988_v12  ;;  %v3006_v19 = vcombine.high %v2972_v10, %v2988_v12  ;;  %3880 = vmatpush3.bf16.msra.mxu1 %v3950_v2  ;;  %v3632_v9 = vld [vmem:[%s4706_s9 + $0x1] ss:$0 sm:$0xff] }
0x10f9   : > { %v2997_v20 = vrot.slane %v2989_v14, %v4199_v49  ;;  %v3004_v25 = vrot.slane %v2990_v15, %v4199_v49  ;;  %v3013_v29 = vrot.slane %v3005_v16, %v4199_v49  ;;  %v3020_v30 = vrot.slane %v3006_v19, %v4199_v49  ;;  %v3952_v14 = vld [vmem:[%s4709_s12 + $0x28] sm:$0xff]   ;;  %v3953_v15 = vld [vmem:[%s4709_s12 + $0x30] sm:$0xff]   ;;  %v3954_v16 = vld [vmem:[%s4709_s12 + $0x38] sm:$0xff]  }
0x10fa   : > { %v3638_v19 = vld [vmem:[%s4708_s11 + $0x1] ss:$0 sm:$0xff] }
0x10fb   : > { %v3025_v31 = vcombine.low %v2997_v20, %v3004_v25  ;;  %v3618_v32 = vcombine.high %v2997_v20, %v3004_v25  ;;  %v3041_v33 = vcombine.low %v3013_v29, %v3020_v30  ;;  %v3619_v34 = vcombine.high %v3013_v29, %v3020_v30 }
0x10fd   : > { %v3032_v36 = vrot.slane %v3025_v31, %v4189_v39  ;;  %v3040_v37 = vrot.slane %v3618_v32, %v4189_v39  ;;  %v3048_v38 = vrot.slane %v3041_v33, %v4189_v39  ;;  %v3056_v40 = vrot.slane %v3619_v34, %v4189_v39 }
0x10ff   : > { %v3058_v7 = vcombine.high %v3032_v36, %v3040_v37  ;;  %v3074_v43 = vcombine.high %v3048_v38, %v3056_v40  ;;  %v3057_v17 = vcombine.low %v3032_v36, %v3040_v37  ;;  %v3073_v44 = vcombine.low %v3048_v38, %v3056_v40 }
0x1101   : > { %v3072_v45 = vrot.slane %v3058_v7, %v4199_v49  ;;  %v3088_v46 = vrot.slane %v3074_v43, %v4199_v49  ;;  %v3065_v47 = vrot.slane %v3057_v17, %v4199_v49  ;;  %v3081_v48 = vrot.slane %v3073_v44, %v4199_v49  ;;  %v3651_v7 = vld [vmem:[%s4710_s13 + $0x1] ss:$0 sm:$0xff] }
0x1103   : > { %v3091_v41 = vcombine.low %v3072_v45, %v3088_v46  ;;  %v3090_v42 = vcombine.high %v3065_v47, %v3081_v48  ;;  %v3092_v21 = vcombine.high %v3072_v45, %v3088_v46  ;;  %v3089_v24 = vcombine.low %v3065_v47, %v3081_v48 }
0x1105   : > { %3098 = vrot.lane.b32.xlu1 %v3091_v41, %s4018_s22  ;;  %3094 = vrot.lane.b32.xlu0 %v3090_v42, %s4724_s25 }
0x1109   : > { %3102 = vrot.lane.b32.xlu0 %v3092_v21, %s4725_s24  ;;  %s582_s24 = scalar_lea.vmem %s4715_s18, %s4727_s28 }
0x1177   : > { %v3095_v39 = vpop.permute.xlu0 %3094  ;;  %v3099_v23 = vpop.permute.xlu1 %3098 }
0x1178   : > { %v3105_v22 = vsel %vm1134_vm2, %v3089_v24, %v3095_v39 }
0x1179   : > { %v3106_v55 = vsel %vm1719_vm4, %v3105_v22, %v3099_v23  ;;  %v3413_v23 = vld [vmem:[%s4713_s16] sm:$0xff]  ;;  %v3414_v22 = vld [vmem:[%s4713_s16 + $0x8] sm:$0xff] }
0x117b   : > { %v3103_v54 = vpop.permute.xlu0 %3102 }
0x117c   : > { %v3107_v56 = vsel %vm1721_vm5, %v3106_v55, %v3103_v54  ;;  %v3415_v54 = vld [vmem:[%s4713_s16 + $0x10] sm:$0xff]  ;;  %v4021_v55 = vmov 0.0|0.0  }
0x117d   : > { %v3108_v49 = vpack.c.bf16 %v3107_v56, %v3107_v56  ;;  %3908 = vmatprep.subr.bf16.mxu1 %v4021_v55  ;;  %v3909_v56 = vpack.c.bf16 %v3414_v22, %v3413_v23 }
0x117f   : > { %3874 = vmatmul.mubr.msk.bf16.vlgmr.msra.gmra.mrb[40].mxu0 %vm587_vm0, %v3108_v49  ;;  %v3416_v49 = vld [vmem:[%s4713_s16 + $0x18] sm:$0xff] }
0x1180   : > { %3893 = vmatprep.mubr.msk.bf16.mxu0 %vm4010_vm1, %v4009_v8  ;;  %3886 = vmatpush3.bf16.msra.mxu0 %v3951_v13 }
0x1181   : > { %3887 = vmatprep.subr.bf16.mxu0 %v4009_v8 }
0x1184   : > { %3888 = vmatpush3.bf16.msra.mxu0 %v3952_v14 }
0x1185   : > { %3889 = vmatprep.subr.bf16.mxu0 %v4009_v8 }
0x1188   : > { %3890 = vmatpush3.bf16.msra.mxu0 %v3953_v15 }
0x1189   : > { %3891 = vmatprep.subr.bf16.mxu0 %v4009_v8 }
0x118c   : > { %3892 = vmatpush3.bf16.msra.mxu0 %v3954_v16 }
0x1252   : > { %v3171_v58 = vpop.f32.mrb[40].mxu0 }
0x1253   : > { %v3172_v60 = vadd.f32 %v3625_v57, %v3171_v58  ;;  %v3875_v50 = vpop.f32.mrb[41].mxu0  ;;  %v3912_v57 = vpack.c.bf16 %v3416_v49, %v3415_v54 }
0x1254   : > { %v3174_v51 = vpop.f32.mrb[42].mxu0 }
0x1255   : > { %v3876_v52 = vpop.f32.mrb[43].mxu0  ;;  %v3177_v28 = vadd.f32 %v3172_v60, %v4424_v27 }
0x1256   : > { %v3659_v52 = vld [vmem:[%s4711_s14 + $0x1] ss:$0 sm:$0xff] }
0x1257   : > { %v3182_v26 = vsel %vm587_vm0, %v3177_v28, 0.0 }
0x1258   : > { %3183 = vadd.xlane.f32.xlu1 %v3182_v26  ;;  %v3660_v26 = vld [vmem:[%s4712_s15 + $0x1] ss:$0 sm:$0xff] }
0x12e5   : > { %v3184_v61 = vpop.xlane.xlu1 %3183 }
0x12e6   : > { %v3185_v53 = vmul.f32 0.03125, %v3184_v61 }
0x12e8   : > { %v3186_v62 = vsub.f32 %v3177_v28, %v3185_v53 }
0x12ea   : > { %v3187_v63 = vmul.f32 %v3186_v62, %v3186_v62 }
0x12ec   : > { %v3188_v0 = vsel %vm587_vm0, %v3187_v63, 0.0 }
0x12ed   : > { %3189 = vadd.xlane.f32.xlu0 %v3188_v0 }
0x137a   : > { %v3190_v27 = vpop.xlane.xlu0 %3189 }
0x137b   : > { %v3191_v3 = vmul.f32 0.03125, %v3190_v27 }
0x137d   : > { %v3192_v4 = vadd.f32 1e-12, %v3191_v3 }
0x137f   : > { %3995 = vrsqrt.f32 %v3192_v4 }
0x1389   : > { %v3996_v5 = vpop.eup %3995 }
0x138a   : > { %v3194_v59 = vmul.f32 %v3996_v5, %v3186_v62  ;;  %v3417_v5 = vld [vmem:[%s4714_s17] sm:$0x1] }
0x138c   : > { %v3201_v10 = vmul.f32 %v3631_v6, %v3194_v59 }
0x138e   : > { %v3208_v11 = vadd.f32 %v3632_v9, %v3201_v10 }
0x1390   : > { %v3209_v12 = vpack.c.bf16 %v3208_v11, %v3208_v11 }
0x1392   : > { %3882 = vmatmul.mubr.msk.bf16.vlgmr.msra.gmra.mrb[44].mxu1 %vm587_vm0, %v3209_v12 }
0x1393   : > { %3905 = vmatprep.mubr.msk.f32.mxu1 %vm4010_vm1, %v4009_v8  ;;  %3910 = vmatpush3.bf16.msra.mxu1 %v3909_v56 }
0x1394   : > { %3911 = vmatprep.subr.bf16.mxu1 %v4021_v55 }
0x1397   : > { %3913 = vmatpush3.bf16.msra.mxu1 %v3912_v57 }
0x1465   : > { %v3272_v18 = vpop.f32.mrb[44].mxu1 }
0x1466   : > { %v3273_v20 = vadd.f32 %v3638_v19, %v3272_v18  ;;  %v3883_v25 = vpop.f32.mrb[45].mxu1 }
0x1467   : > { %v3275_v29 = vpop.f32.mrb[46].mxu1 }
0x1468   : > { %v3278_v30 = vmul.f32 %v3273_v20, %v3273_v20  ;;  %v3884_v31 = vpop.f32.mrb[47].mxu1 }
0x146a   : > { %v3279_v32 = vmul.f32 %v3278_v30, %v3273_v20 }
0x146c   : > { %v3280_v33 = vmul.f32 0.044715, %v3279_v32 }
0x146e   : > { %v3281_v34 = vadd.f32 %v3280_v33, %v3273_v20 }
0x1470   : > { %v3282_v35 = vmul.f32 0.7978846, %v3281_v34 }
0x1472   : > { %3997 = vtanh.f32 %v3282_v35 }
0x147c   : > { %v3998_v8 = vpop.eup %3997 }
0x147d   : > { %v3284_v36 = vadd.f32 1.0, %v3998_v8 }
0x147f   : > { %v3285_v37 = vmul.f32 0.5, %v3284_v36 }
0x1481   : > { %v3286_v38 = vmul.f32 %v3285_v37, %v3273_v20 }
0x1483   : > { %v3287_v40 = vpack.c.bf16 %v3286_v38, %v3286_v38 }
0x1485   : > { %3894 = vmatmul.mubr.msk.bf16.vlgmr.msra.gmra.mrb[44].mxu0 %vm1936_vm6, %v3287_v40 }
0x1558   : > { %v3366_v43 = vpop.f32.mrb[44].mxu0 }
0x1559   : > { %v3367_v17 = vadd.f32 %v3651_v7, %v3366_v43  ;;  %v3895_v44 = vpop.f32.mrb[45].mxu0 }
0x155a   : > { %v3369_v45 = vpop.f32.mrb[46].mxu0 }
0x155b   : > { %v3896_v46 = vpop.f32.mrb[47].mxu0  ;;  %v3372_v47 = vadd.f32 %v3367_v17, %v3208_v11 }
0x155d   : > { %v3377_v48 = vsel %vm587_vm0, %v3372_v47, 0.0 }
0x155e   : > { %3378 = vadd.xlane.f32.xlu0 %v3377_v48 }
0x15eb   : > { %v3379_v41 = vpop.xlane.xlu0 %3378 }
0x15ec   : > { %v3380_v42 = vmul.f32 0.03125, %v3379_v41 }
0x15ee   : > { %v3381_v21 = vsub.f32 %v3372_v47, %v3380_v42 }
0x15f0   : > { %v3382_v24 = vmul.f32 %v3381_v21, %v3381_v21 }
0x15f2   : > { %v3383_v39 = vsel %vm587_vm0, %v3382_v24, 0.0 }
0x15f3   : > { %3384 = vadd.xlane.f32.xlu1 %v3383_v39 }
0x1680   : > { %v3385_v58 = vpop.xlane.xlu1 %3384 }
0x1681   : > { %v3386_v60 = vmul.f32 0.03125, %v3385_v58 }
0x1683   : > { %v3387_v50 = vadd.f32 1e-12, %v3386_v60 }
0x1685   : > { %3999 = vrsqrt.f32 %v3387_v50 }
0x168f   : > { %v4000_v51 = vpop.eup %3999 }
0x1690   : > { %v3389_v28 = vmul.f32 %v4000_v51, %v3381_v21 }
0x1692   : > { %v3396_v61 = vmul.f32 %v3659_v52, %v3389_v28 }
0x1694   : > { %v3403_v53 = vadd.f32 %v3660_v26, %v3396_v61 }
0x1696   : > { %v3404_v62 = vsel %vm587_vm0, %v3403_v53, 0.0 }
0x1697   : > { %v3405_v63 = vrot.slane %v3404_v62, 4 }
0x1699   : > { %v3406_v0 = vadd.f32 %v3405_v63, %v3404_v62 }
0x169b   : > { %v3407_v1 = vrot.slane %v3406_v0, 2 }
0x169d   : > { %v3408_v2 = vadd.f32 %v3407_v1, %v3406_v0 }
0x169f   : > { %v3409_v27 = vrot.slane %v3408_v2, 1 }
0x16a1   : > { %v3410_v3 = vadd.f32 %v3409_v27, %v3408_v2 }
0x16a3   : > { %v3412_v4 = vmul.f32 0.125, %v3410_v3 }
0x16a5   : > { %3906 = vmatmul.mubr.msk.f32.vlgmr.msra.gmra.mrb[48].mxu1 %vm587_vm0, %v3412_v4 }
0x1778   : > { %v3487_v6 = vpop.f32.mrb[48].mxu1 }
0x1779   : > { %v3488_v59 = vadd.f32 %v3487_v6, %v3417_v5  ;;  %v3907_v9 = vpop.f32.mrb[49].mxu1 }
0x177b   : > { %3491 = vst [vmem:[%s582_s24] sm:$0x1] %v3488_v59 }
0x177c PF: > { %s28_s27 = sadd.s32 1, %s4007_s27  }
0x177d   : > { %p25_p4 = scmp.ge.s32.totalorder %s28_s27, 4  }
0x177f   :  { %27 = sbr.rel (!%p25_p4) target bundleno = 4 (0x4), region = 137 }

</bundles_post_ra>
